<compile_context>
chip_gen: v6e
topology: v6e:2x2x1
jax: 0.10.0
libtpu: 0.0.40
codegen_flags: <defaults>
</compile_context>

<pallas_src>
import functools

import jax
import jax.numpy as jnp
from jax import lax
from jax.experimental import pallas as pl
from jax.experimental.pallas import tpu as pltpu


def _round_up(x, m):
    return (x + m - 1) // m * m


def _pad_axis(a, axis, new_size):
    if a.shape[axis] == new_size:
        return a
    pads = [(0, 0)] * a.ndim
    pads[axis] = (0, new_size - a.shape[axis])
    return jnp.pad(a, pads)


def _lstm_chunk_kernel(x_ref, wih_t_ref, whh_t_ref, b_ref, h0_ref, c0_ref,
                       out_ref, h_sc, c_sc, xg_sc, *, unroll):
    """One grid iteration = one chunk of T time steps.

    x_ref    : (T*Bp, E)   time-major embedded input chunk (compute dtype)
    wih_t_ref: (E, 4*Hp)   W_ih^T, gate-blocked & zero-padded (compute dtype)
    whh_t_ref: (Hp, 4*Hp)  W_hh^T, gate-blocked & zero-padded (compute dtype)
    b_ref    : (1, 4*Hp)   b_ih + b_hh, gate-blocked & zero-padded, f32
    h0_ref   : (Bp, Hp)    initial hidden state (zero-padded), f32
    c0_ref   : (Bp, Hp)    initial cell state (zero-padded), f32
    out_ref  : (T*Bp, Hp)  hidden states for this chunk (row t*Bp + b), f32
    h_sc/c_sc: (Bp, Hp)    recurrent state carried across grid iterations, f32
    xg_sc    : (T*Bp, 4Hp) per-chunk input projection (+ bias), f32
    """
    Bp, Hp = h0_ref.shape
    T = x_ref.shape[0] // Bp

    @pl.when(pl.program_id(0) == 0)
    def _():
        h_sc[...] = h0_ref[...].astype(jnp.float32)
        c_sc[...] = c0_ref[...].astype(jnp.float32)

    # Per-chunk input projection: one MXU matmul with M = T*Bp rows, bias folded.
    xg_sc[...] = (jnp.dot(x_ref[...], wih_t_ref[...],
                          preferred_element_type=jnp.float32)
                  + b_ref[...].astype(jnp.float32))

    def step(t, carry):
        row = pl.multiple_of(t * Bp, Bp)          # sublane-tile-aligned offset
        h_prev = h_sc[...]
        c_prev = c_sc[...]
        # Recurrent matmul on the serial critical path (f32 accumulation).
        gates = xg_sc[pl.ds(row, Bp), :] + jnp.dot(
            h_prev.astype(whh_t_ref.dtype), whh_t_ref[...],
            preferred_element_type=jnp.float32)                     # (Bp, 4Hp)
        # Lane-aligned gate tiles (Hp multiple of 128); PyTorch gate order i,f,g,o.
        # Elementwise math kept f32 (portable incl. v5e which lacks bf16 VPU/EUP).
        i_g = jax.nn.sigmoid(gates[:, 0 * Hp:1 * Hp])
        f_g = jax.nn.sigmoid(gates[:, 1 * Hp:2 * Hp])
        g_g = jnp.tanh(gates[:, 2 * Hp:3 * Hp])
        o_g = jax.nn.sigmoid(gates[:, 3 * Hp:4 * Hp])
        c_new = f_g * c_prev + i_g * g_g
        h_new = o_g * jnp.tanh(c_new)
        c_sc[...] = c_new
        h_sc[...] = h_new
        out_ref[pl.ds(row, Bp), :] = h_new.astype(out_ref.dtype)   # lane-dense store
        return carry

    lax.fori_loop(0, T, step, 0, unroll=unroll)


def context_lstm_forward(x_ids, hidden1, hidden2, params, *,
                         compute_dtype=jnp.float32, t_chunk=8, unroll=4):
    """Pallas implementation of context_lstm.forward.

    x_ids  : (B, S) int32 token ids
    hidden1: (1, B, H) initial h
    hidden2: (1, B, H) initial c
    returns: (B, S, H) output sequence (batch_first, like PyTorch), f32
    """
    emb_table = params["embedding"]          # (V, E), frozen
    w_ih = params["w_ih"]                    # (4H, E)
    w_hh = params["w_hh"]                    # (4H, H)
    b = params["b_ih"] + params["b_hh"]      # (4H,)

    B, S = x_ids.shape
    E = emb_table.shape[1]
    H = w_hh.shape[1]

    Hp = _round_up(H, 128)                   # each gate gets a full 128-lane tile
    Bp = _round_up(B, 8)                     # full sublane tile
    T = max(1, min(t_chunk, S))              # time-chunk length (steps per grid iter)
    Sp = _round_up(S, T)                     # time padded to a whole number of chunks
    n_chunks = Sp // T

    # Gate-blocked zero padding + pre-transpose (done once, outside the kernel).
    wih_t = jnp.transpose(
        _pad_axis(w_ih.reshape(4, H, E), 1, Hp), (2, 0, 1)
    ).reshape(E, 4 * Hp).astype(compute_dtype)
    whh_t = jnp.transpose(
        _pad_axis(_pad_axis(w_hh.reshape(4, H, H), 1, Hp), 2, Hp), (2, 0, 1)
    ).reshape(Hp, 4 * Hp).astype(compute_dtype)
    bias = _pad_axis(b.reshape(4, H), 1, Hp).reshape(1, 4 * Hp).astype(jnp.float32)

    # Frozen embedding lookup, built directly time-major; fuse batch/time padding.
    x_tm = emb_table[x_ids.T]                                   # (S, B, E)
    x_tm = _pad_axis(_pad_axis(x_tm, 1, Bp), 0, Sp)             # (Sp, Bp, E)
    x_flat = x_tm.reshape(Sp * Bp, E).astype(compute_dtype)     # (Sp*Bp, E)

    h0 = _pad_axis(_pad_axis(hidden1[0], 0, Bp), 1, Hp).astype(jnp.float32)
    c0 = _pad_axis(_pad_axis(hidden2[0], 0, Bp), 1, Hp).astype(jnp.float32)

    # VMEM budget: weights + bias + h0/c0 + double-buffered x/out chunks + scratch.
    cbytes = jnp.dtype(compute_dtype).itemsize
    resident = (
        E * 4 * Hp * cbytes + Hp * 4 * Hp * cbytes + 4 * Hp * 4   # weights + bias
        + 2 * 2 * Bp * Hp * 4                                     # h0/c0 (2 bufs)
        + 2 * T * Bp * E * cbytes                                 # x chunk (2 bufs)
        + 2 * T * Bp * Hp * 4                                     # out chunk (2 bufs)
        + 2 * Bp * Hp * 4                                         # h/c scratch
        + T * Bp * 4 * Hp * 4                                     # xg scratch
    )
    vmem_limit = min(100 * 1024 * 1024, int(resident * 2) + (4 << 20))

    grid_spec = pltpu.PrefetchScalarGridSpec(
        num_scalar_prefetch=0,
        grid=(n_chunks,),
        in_specs=[
            pl.BlockSpec((T * Bp, E), lambda s: (s, 0)),      # streamed x chunk
            pl.BlockSpec((E, 4 * Hp), lambda s: (0, 0)),      # resident weights
            pl.BlockSpec((Hp, 4 * Hp), lambda s: (0, 0)),
            pl.BlockSpec((1, 4 * Hp), lambda s: (0, 0)),
            pl.BlockSpec((Bp, Hp), lambda s: (0, 0)),
            pl.BlockSpec((Bp, Hp), lambda s: (0, 0)),
        ],
        out_specs=pl.BlockSpec((T * Bp, Hp), lambda s: (s, 0)),  # streamed out chunk
        scratch_shapes=[
            pltpu.VMEM((Bp, Hp), jnp.float32),                # h carry
            pltpu.VMEM((Bp, Hp), jnp.float32),                # c carry
            pltpu.VMEM((T * Bp, 4 * Hp), jnp.float32),        # per-chunk input proj
        ],
    )

    out_flat = pl.pallas_call(
        functools.partial(_lstm_chunk_kernel, unroll=unroll),
        out_shape=jax.ShapeDtypeStruct((Sp * Bp, Hp), jnp.float32),
        grid_spec=grid_spec,
        compiler_params=pltpu.CompilerParams(
            dimension_semantics=("arbitrary",),               # serial recurrence
            vmem_limit_bytes=vmem_limit,
        ),
    )(x_flat, wih_t, whh_t, bias, h0, c0)

    out = out_flat.reshape(Sp, Bp, Hp)[:S, :B, :H]            # drop padding
    return jnp.transpose(out, (1, 0, 2))                      # (B, S, H) batch_first


def _reference_lstm(x_ids, hidden1, hidden2, params):
    """Pure-JAX reference matching torch.nn.LSTM semantics (gate order i,f,g,o)."""
    x_emb = params["embedding"][x_ids]                    # (B, S, E)
    w_ih, w_hh = params["w_ih"], params["w_hh"]
    b = params["b_ih"] + params["b_hh"]
    H = w_hh.shape[1]

    def step(carry, x_t):
        h, c = carry
        gates = x_t @ w_ih.T + h @ w_hh.T + b
        i = jax.nn.sigmoid(gates[:, 0 * H:1 * H])
        f = jax.nn.sigmoid(gates[:, 1 * H:2 * H])
        g = jnp.tanh(gates[:, 2 * H:3 * H])
        o = jax.nn.sigmoid(gates[:, 3 * H:4 * H])
        c = f * c + i * g
        h = o * jnp.tanh(c)
        return (h, c), h

    (_, _), out = jax.lax.scan(step, (hidden1[0], hidden2[0]),
                               jnp.transpose(x_emb, (1, 0, 2)))
    return jnp.transpose(out, (1, 0, 2))


if __name__ == "__main__":
    # Small shapes consistent with the module's forward.
    VOCAB = 16
    EMBED = 32        # embed_size
    HIDDEN = 32       # hidden_units
    BATCH = 2
    SEQ = 8

    key = jax.random.PRNGKey(0)
    k_emb, k_wih, k_whh, k_bih, k_bhh, k_x, k_h, k_c = jax.random.split(key, 8)

    bound = 1.0 / jnp.sqrt(jnp.float32(HIDDEN))
    params = {
        "embedding": jax.random.normal(k_emb, (VOCAB, EMBED), jnp.float32),
        "w_ih": jax.random.uniform(k_wih, (4 * HIDDEN, EMBED), jnp.float32, -bound, bound),
        "w_hh": jax.random.uniform(k_whh, (4 * HIDDEN, HIDDEN), jnp.float32, -bound, bound),
        "b_ih": jax.random.uniform(k_bih, (4 * HIDDEN,), jnp.float32, -bound, bound),
        "b_hh": jax.random.uniform(k_bhh, (4 * HIDDEN,), jnp.float32, -bound, bound),
    }

    x_ids = jax.random.randint(k_x, (BATCH, SEQ), 0, VOCAB, dtype=jnp.int32)
    hidden1 = jax.random.normal(k_h, (1, BATCH, HIDDEN), jnp.float32)  # h0
    hidden2 = jax.random.normal(k_c, (1, BATCH, HIDDEN), jnp.float32)  # c0

    ref = jax.block_until_ready(_reference_lstm(x_ids, hidden1, hidden2, params))

    # f32 path (tight tolerance); t_chunk=4 -> 2 chunks, exercises the h/c carry
    # across grid iterations and the streaming input/output DMA.
    out_f32 = jax.block_until_ready(
        context_lstm_forward(x_ids, hidden1, hidden2, params,
                             compute_dtype=jnp.float32, t_chunk=4, unroll=4))
    assert out_f32.shape == (BATCH, SEQ, HIDDEN)
    assert jnp.allclose(out_f32, ref, atol=1e-5, rtol=1e-5), "f32 mismatch vs reference"

    # bf16 compute path (production setting): bf16 weights/x, f32 accumulation and
    # f32 h/c carries; looser tolerance per the bf16 drift bound.
    out_bf16 = jax.block_until_ready(
        context_lstm_forward(x_ids, hidden1, hidden2, params,
                             compute_dtype=jnp.bfloat16, t_chunk=4, unroll=4))
    assert jnp.allclose(out_bf16, ref, atol=5e-2, rtol=5e-2), "bf16 mismatch vs reference"

    print("KERNEL_OK")
</pallas_src>

<mosaic_0001>
module attributes {stable_mosaic.version = 11 : i64} {
  func.func @_lstm_chunk_kernel(%arg0: i32, %arg1: memref<32x32xf32, #tpu.memory_space<vmem>>, %arg2: memref<32x512xf32, #tpu.memory_space<vmem>>, %arg3: memref<128x512xf32, #tpu.memory_space<vmem>>, %arg4: memref<1x512xf32, #tpu.memory_space<vmem>>, %arg5: memref<8x128xf32, #tpu.memory_space<vmem>>, %arg6: memref<8x128xf32, #tpu.memory_space<vmem>>, %arg7: memref<32x128xf32, #tpu.memory_space<vmem>>, %arg8: memref<8x128xf32, #tpu.memory_space<vmem>>, %arg9: memref<8x128xf32, #tpu.memory_space<vmem>>, %arg10: memref<32x512xf32, #tpu.memory_space<vmem>>) attributes {dimension_semantics = [#tpu.dimension_semantics<arbitrary>], iteration_bounds = array<i64: 2>, scalar_prefetch = 0 : i64, scratch_operands = 3 : i64, tpu.core_type = #tpu.core_type<tc>, window_params = [{transform_indices = @transform_0, window_bounds = array<i64: 32, 32>}, {pipeline_mode = #tpu.pipeline_mode<synchronous>, transform_indices = @transform_1, window_bounds = array<i64: 32, 512>}, {pipeline_mode = #tpu.pipeline_mode<synchronous>, transform_indices = @transform_2, window_bounds = array<i64: 128, 512>}, {pipeline_mode = #tpu.pipeline_mode<synchronous>, transform_indices = @transform_3, window_bounds = array<i64: 1, 512>}, {pipeline_mode = #tpu.pipeline_mode<synchronous>, transform_indices = @transform_4, window_bounds = array<i64: 8, 128>}, {pipeline_mode = #tpu.pipeline_mode<synchronous>, transform_indices = @transform_5, window_bounds = array<i64: 8, 128>}, {transform_indices = @transform_6, window_bounds = array<i64: 32, 128>}]} {
    %c0_i32 = arith.constant 0 : i32
    %0 = arith.cmpi eq, %arg0, %c0_i32 : i32
    %1 = arith.extui %0 : i1 to i32
    %c0_i32_0 = arith.constant 0 : i32
    %2 = arith.cmpi ne, %1, %c0_i32_0 : i32
    scf.if %2 {
      %c0_76 = arith.constant 0 : index
      %c0_77 = arith.constant 0 : index
      %162 = vector.load %arg5[%c0_76, %c0_77] : memref<8x128xf32, #tpu.memory_space<vmem>>, vector<8x128xf32>
      %c0_78 = arith.constant 0 : index
      %c0_79 = arith.constant 0 : index
      %163 = vector.load %arg8[%c0_78, %c0_79] : memref<8x128xf32, #tpu.memory_space<vmem>>, vector<8x128xf32>
      tpu.vector_store %arg8[%c0_78, %c0_79], %162 {strides = array<i32>} : memref<8x128xf32, #tpu.memory_space<vmem>>, vector<8x128xf32>,
      %c0_80 = arith.constant 0 : index
      %c0_81 = arith.constant 0 : index
      %164 = vector.load %arg6[%c0_80, %c0_81] : memref<8x128xf32, #tpu.memory_space<vmem>>, vector<8x128xf32>
      %c0_82 = arith.constant 0 : index
      %c0_83 = arith.constant 0 : index
      %165 = vector.load %arg9[%c0_82, %c0_83] : memref<8x128xf32, #tpu.memory_space<vmem>>, vector<8x128xf32>
      tpu.vector_store %arg9[%c0_82, %c0_83], %164 {strides = array<i32>} : memref<8x128xf32, #tpu.memory_space<vmem>>, vector<8x128xf32>,
    } else {
    }
    %c0 = arith.constant 0 : index
    %c0_1 = arith.constant 0 : index
    %3 = vector.load %arg1[%c0, %c0_1] : memref<32x32xf32, #tpu.memory_space<vmem>>, vector<32x32xf32>
    %c0_2 = arith.constant 0 : index
    %c0_3 = arith.constant 0 : index
    %4 = vector.load %arg2[%c0_2, %c0_3] : memref<32x512xf32, #tpu.memory_space<vmem>>, vector<32x512xf32>
    %cst = arith.constant dense<0.000000e+00> : vector<32x512xf32>
    %5 = tpu.matmul %3, %4, %cst {dimension_numbers = #tpu.dot_dimension_numbers<[1], [0], [0], [1], [0, 0, 1, 1], [], []>} : vector<32x32xf32>, vector<32x512xf32>, vector<32x512xf32> -> vector<32x512xf32>
    %c0_4 = arith.constant 0 : index
    %c0_5 = arith.constant 0 : index
    %6 = vector.load %arg4[%c0_4, %c0_5] : memref<1x512xf32, #tpu.memory_space<vmem>>, vector<1x512xf32>
    %7 = vector.broadcast %6 : vector<1x512xf32> to vector<32x512xf32>
    %8 = arith.addf %5, %7 : vector<32x512xf32>
    %c0_6 = arith.constant 0 : index
    %c0_7 = arith.constant 0 : index
    %9 = vector.load %arg10[%c0_6, %c0_7] : memref<32x512xf32, #tpu.memory_space<vmem>>, vector<32x512xf32>
    tpu.vector_store %arg10[%c0_6, %c0_7], %8 {strides = array<i32>} : memref<32x512xf32, #tpu.memory_space<vmem>>, vector<32x512xf32>,
    %c0_i32_8 = arith.constant 0 : i32
    %c8_i32 = arith.constant 8 : i32
    %10 = arith.muli %c0_i32_8, %c8_i32 : i32
    %11 = tpu.assume_multiple %10, 8 : i32
    %c0_9 = arith.constant 0 : index
    %c0_10 = arith.constant 0 : index
    %12 = vector.load %arg8[%c0_9, %c0_10] : memref<8x128xf32, #tpu.memory_space<vmem>>, vector<8x128xf32>
    %c0_11 = arith.constant 0 : index
    %c0_12 = arith.constant 0 : index
    %13 = vector.load %arg9[%c0_11, %c0_12] : memref<8x128xf32, #tpu.memory_space<vmem>>, vector<8x128xf32>
    %14 = arith.index_cast %11 : i32 to index
    %c0_13 = arith.constant 0 : index
    %15 = vector.load %arg10[%14, %c0_13] : memref<32x512xf32, #tpu.memory_space<vmem>>, vector<8x512xf32>
    %c0_14 = arith.constant 0 : index
    %c0_15 = arith.constant 0 : index
    %16 = vector.load %arg3[%c0_14, %c0_15] : memref<128x512xf32, #tpu.memory_space<vmem>>, vector<128x512xf32>
    %cst_16 = arith.constant dense<0.000000e+00> : vector<8x512xf32>
    %17 = tpu.matmul %12, %16, %cst_16 {dimension_numbers = #tpu.dot_dimension_numbers<[1], [0], [0], [1], [0, 0, 1, 1], [], []>} : vector<8x128xf32>, vector<128x512xf32>, vector<8x512xf32> -> vector<8x512xf32>
    %18 = arith.addf %15, %17 : vector<8x512xf32>
    %19 = vector.extract_strided_slice %18 {offsets = [0, 0], sizes = [8, 128], strides = [1, 1]} : vector<8x512xf32> to vector<8x128xf32>
    %20 = arith.negf %19 : vector<8x128xf32>
    %21 = math.exp %20 : vector<8x128xf32>
    %cst_17 = arith.constant 1.000000e+00 : f32
    %22 = vector.broadcast %cst_17 : f32 to vector<8x128xf32>
    %23 = arith.addf %22, %21 : vector<8x128xf32>
    %24 = arith.divf %22, %23 : vector<8x128xf32>
    %25 = vector.extract_strided_slice %18 {offsets = [0, 128], sizes = [8, 128], strides = [1, 1]} : vector<8x512xf32> to vector<8x128xf32>
    %26 = arith.negf %25 : vector<8x128xf32>
    %27 = math.exp %26 : vector<8x128xf32>
    %cst_18 = arith.constant 1.000000e+00 : f32
    %28 = vector.broadcast %cst_18 : f32 to vector<8x128xf32>
    %29 = arith.addf %28, %27 : vector<8x128xf32>
    %30 = arith.divf %28, %29 : vector<8x128xf32>
    %31 = vector.extract_strided_slice %18 {offsets = [0, 256], sizes = [8, 128], strides = [1, 1]} : vector<8x512xf32> to vector<8x128xf32>
    %32 = math.tanh %31 : vector<8x128xf32>
    %33 = vector.extract_strided_slice %18 {offsets = [0, 384], sizes = [8, 128], strides = [1, 1]} : vector<8x512xf32> to vector<8x128xf32>
    %34 = arith.negf %33 : vector<8x128xf32>
    %35 = math.exp %34 : vector<8x128xf32>
    %cst_19 = arith.constant 1.000000e+00 : f32
    %36 = vector.broadcast %cst_19 : f32 to vector<8x128xf32>
    %37 = arith.addf %36, %35 : vector<8x128xf32>
    %38 = arith.divf %36, %37 : vector<8x128xf32>
    %39 = arith.mulf %30, %13 : vector<8x128xf32>
    %40 = arith.mulf %24, %32 : vector<8x128xf32>
    %41 = arith.addf %39, %40 : vector<8x128xf32>
    %42 = math.tanh %41 : vector<8x128xf32>
    %43 = arith.mulf %38, %42 : vector<8x128xf32>
    %c0_20 = arith.constant 0 : index
    %c0_21 = arith.constant 0 : index
    %44 = vector.load %arg9[%c0_20, %c0_21] : memref<8x128xf32, #tpu.memory_space<vmem>>, vector<8x128xf32>
    tpu.vector_store %arg9[%c0_20, %c0_21], %41 {strides = array<i32>} : memref<8x128xf32, #tpu.memory_space<vmem>>, vector<8x128xf32>,
    %c0_22 = arith.constant 0 : index
    %c0_23 = arith.constant 0 : index
    %45 = vector.load %arg8[%c0_22, %c0_23] : memref<8x128xf32, #tpu.memory_space<vmem>>, vector<8x128xf32>
    tpu.vector_store %arg8[%c0_22, %c0_23], %43 {strides = array<i32>} : memref<8x128xf32, #tpu.memory_space<vmem>>, vector<8x128xf32>,
    %46 = arith.index_cast %11 : i32 to index
    %c0_24 = arith.constant 0 : index
    %47 = vector.load %arg7[%46, %c0_24] : memref<32x128xf32, #tpu.memory_space<vmem>>, vector<8x128xf32>
    tpu.vector_store %arg7[%46, %c0_24], %43 {strides = array<i32>} : memref<32x128xf32, #tpu.memory_space<vmem>>, vector<8x128xf32>,
    %c1_i32 = arith.constant 1 : i32
    %c8_i32_25 = arith.constant 8 : i32
    %48 = arith.muli %c1_i32, %c8_i32_25 : i32
    %49 = tpu.assume_multiple %48, 8 : i32
    %c0_26 = arith.constant 0 : index
    %c0_27 = arith.constant 0 : index
    %50 = vector.load %arg8[%c0_26, %c0_27] : memref<8x128xf32, #tpu.memory_space<vmem>>, vector<8x128xf32>
    %c0_28 = arith.constant 0 : index
    %c0_29 = arith.constant 0 : index
    %51 = vector.load %arg9[%c0_28, %c0_29] : memref<8x128xf32, #tpu.memory_space<vmem>>, vector<8x128xf32>
    %52 = arith.index_cast %49 : i32 to index
    %c0_30 = arith.constant 0 : index
    %53 = vector.load %arg10[%52, %c0_30] : memref<32x512xf32, #tpu.memory_space<vmem>>, vector<8x512xf32>
    %c0_31 = arith.constant 0 : index
    %c0_32 = arith.constant 0 : index
    %54 = vector.load %arg3[%c0_31, %c0_32] : memref<128x512xf32, #tpu.memory_space<vmem>>, vector<128x512xf32>
    %cst_33 = arith.constant dense<0.000000e+00> : vector<8x512xf32>
    %55 = tpu.matmul %50, %54, %cst_33 {dimension_numbers = #tpu.dot_dimension_numbers<[1], [0], [0], [1], [0, 0, 1, 1], [], []>} : vector<8x128xf32>, vector<128x512xf32>, vector<8x512xf32> -> vector<8x512xf32>
    %56 = arith.addf %53, %55 : vector<8x512xf32>
    %57 = vector.extract_strided_slice %56 {offsets = [0, 0], sizes = [8, 128], strides = [1, 1]} : vector<8x512xf32> to vector<8x128xf32>
    %58 = arith.negf %57 : vector<8x128xf32>
    %59 = math.exp %58 : vector<8x128xf32>
    %cst_34 = arith.constant 1.000000e+00 : f32
    %60 = vector.broadcast %cst_34 : f32 to vector<8x128xf32>
    %61 = arith.addf %60, %59 : vector<8x128xf32>
    %62 = arith.divf %60, %61 : vector<8x128xf32>
    %63 = vector.extract_strided_slice %56 {offsets = [0, 128], sizes = [8, 128], strides = [1, 1]} : vector<8x512xf32> to vector<8x128xf32>
    %64 = arith.negf %63 : vector<8x128xf32>
    %65 = math.exp %64 : vector<8x128xf32>
    %cst_35 = arith.constant 1.000000e+00 : f32
    %66 = vector.broadcast %cst_35 : f32 to vector<8x128xf32>
    %67 = arith.addf %66, %65 : vector<8x128xf32>
    %68 = arith.divf %66, %67 : vector<8x128xf32>
    %69 = vector.extract_strided_slice %56 {offsets = [0, 256], sizes = [8, 128], strides = [1, 1]} : vector<8x512xf32> to vector<8x128xf32>
    %70 = math.tanh %69 : vector<8x128xf32>
    %71 = vector.extract_strided_slice %56 {offsets = [0, 384], sizes = [8, 128], strides = [1, 1]} : vector<8x512xf32> to vector<8x128xf32>
    %72 = arith.negf %71 : vector<8x128xf32>
    %73 = math.exp %72 : vector<8x128xf32>
    %cst_36 = arith.constant 1.000000e+00 : f32
    %74 = vector.broadcast %cst_36 : f32 to vector<8x128xf32>
    %75 = arith.addf %74, %73 : vector<8x128xf32>
    %76 = arith.divf %74, %75 : vector<8x128xf32>
    %77 = arith.mulf %68, %51 : vector<8x128xf32>
    %78 = arith.mulf %62, %70 : vector<8x128xf32>
    %79 = arith.addf %77, %78 : vector<8x128xf32>
    %80 = math.tanh %79 : vector<8x128xf32>
    %81 = arith.mulf %76, %80 : vector<8x128xf32>
    %c0_37 = arith.constant 0 : index
    %c0_38 = arith.constant 0 : index
    %82 = vector.load %arg9[%c0_37, %c0_38] : memref<8x128xf32, #tpu.memory_space<vmem>>, vector<8x128xf32>
    tpu.vector_store %arg9[%c0_37, %c0_38], %79 {strides = array<i32>} : memref<8x128xf32, #tpu.memory_space<vmem>>, vector<8x128xf32>,
    %c0_39 = arith.constant 0 : index
    %c0_40 = arith.constant 0 : index
    %83 = vector.load %arg8[%c0_39, %c0_40] : memref<8x128xf32, #tpu.memory_space<vmem>>, vector<8x128xf32>
    tpu.vector_store %arg8[%c0_39, %c0_40], %81 {strides = array<i32>} : memref<8x128xf32, #tpu.memory_space<vmem>>, vector<8x128xf32>,
    %84 = arith.index_cast %49 : i32 to index
    %c0_41 = arith.constant 0 : index
    %85 = vector.load %arg7[%84, %c0_41] : memref<32x128xf32, #tpu.memory_space<vmem>>, vector<8x128xf32>
    tpu.vector_store %arg7[%84, %c0_41], %81 {strides = array<i32>} : memref<32x128xf32, #tpu.memory_space<vmem>>, vector<8x128xf32>,
    %c2_i32 = arith.constant 2 : i32
    %c8_i32_42 = arith.constant 8 : i32
    %86 = arith.muli %c2_i32, %c8_i32_42 : i32
    %87 = tpu.assume_multiple %86, 8 : i32
    %c0_43 = arith.constant 0 : index
    %c0_44 = arith.constant 0 : index
    %88 = vector.load %arg8[%c0_43, %c0_44] : memref<8x128xf32, #tpu.memory_space<vmem>>, vector<8x128xf32>
    %c0_45 = arith.constant 0 : index
    %c0_46 = arith.constant 0 : index
    %89 = vector.load %arg9[%c0_45, %c0_46] : memref<8x128xf32, #tpu.memory_space<vmem>>, vector<8x128xf32>
    %90 = arith.index_cast %87 : i32 to index
    %c0_47 = arith.constant 0 : index
    %91 = vector.load %arg10[%90, %c0_47] : memref<32x512xf32, #tpu.memory_space<vmem>>, vector<8x512xf32>
    %c0_48 = arith.constant 0 : index
    %c0_49 = arith.constant 0 : index
    %92 = vector.load %arg3[%c0_48, %c0_49] : memref<128x512xf32, #tpu.memory_space<vmem>>, vector<128x512xf32>
    %cst_50 = arith.constant dense<0.000000e+00> : vector<8x512xf32>
    %93 = tpu.matmul %88, %92, %cst_50 {dimension_numbers = #tpu.dot_dimension_numbers<[1], [0], [0], [1], [0, 0, 1, 1], [], []>} : vector<8x128xf32>, vector<128x512xf32>, vector<8x512xf32> -> vector<8x512xf32>
    %94 = arith.addf %91, %93 : vector<8x512xf32>
    %95 = vector.extract_strided_slice %94 {offsets = [0, 0], sizes = [8, 128], strides = [1, 1]} : vector<8x512xf32> to vector<8x128xf32>
    %96 = arith.negf %95 : vector<8x128xf32>
    %97 = math.exp %96 : vector<8x128xf32>
    %cst_51 = arith.constant 1.000000e+00 : f32
    %98 = vector.broadcast %cst_51 : f32 to vector<8x128xf32>
    %99 = arith.addf %98, %97 : vector<8x128xf32>
    %100 = arith.divf %98, %99 : vector<8x128xf32>
    %101 = vector.extract_strided_slice %94 {offsets = [0, 128], sizes = [8, 128], strides = [1, 1]} : vector<8x512xf32> to vector<8x128xf32>
    %102 = arith.negf %101 : vector<8x128xf32>
    %103 = math.exp %102 : vector<8x128xf32>
    %cst_52 = arith.constant 1.000000e+00 : f32
    %104 = vector.broadcast %cst_52 : f32 to vector<8x128xf32>
    %105 = arith.addf %104, %103 : vector<8x128xf32>
    %106 = arith.divf %104, %105 : vector<8x128xf32>
    %107 = vector.extract_strided_slice %94 {offsets = [0, 256], sizes = [8, 128], strides = [1, 1]} : vector<8x512xf32> to vector<8x128xf32>
    %108 = math.tanh %107 : vector<8x128xf32>
    %109 = vector.extract_strided_slice %94 {offsets = [0, 384], sizes = [8, 128], strides = [1, 1]} : vector<8x512xf32> to vector<8x128xf32>
    %110 = arith.negf %109 : vector<8x128xf32>
    %111 = math.exp %110 : vector<8x128xf32>
    %cst_53 = arith.constant 1.000000e+00 : f32
    %112 = vector.broadcast %cst_53 : f32 to vector<8x128xf32>
    %113 = arith.addf %112, %111 : vector<8x128xf32>
    %114 = arith.divf %112, %113 : vector<8x128xf32>
    %115 = arith.mulf %106, %89 : vector<8x128xf32>
    %116 = arith.mulf %100, %108 : vector<8x128xf32>
    %117 = arith.addf %115, %116 : vector<8x128xf32>
    %118 = math.tanh %117 : vector<8x128xf32>
    %119 = arith.mulf %114, %118 : vector<8x128xf32>
    %c0_54 = arith.constant 0 : index
    %c0_55 = arith.constant 0 : index
    %120 = vector.load %arg9[%c0_54, %c0_55] : memref<8x128xf32, #tpu.memory_space<vmem>>, vector<8x128xf32>
    tpu.vector_store %arg9[%c0_54, %c0_55], %117 {strides = array<i32>} : memref<8x128xf32, #tpu.memory_space<vmem>>, vector<8x128xf32>,
    %c0_56 = arith.constant 0 : index
    %c0_57 = arith.constant 0 : index
    %121 = vector.load %arg8[%c0_56, %c0_57] : memref<8x128xf32, #tpu.memory_space<vmem>>, vector<8x128xf32>
    tpu.vector_store %arg8[%c0_56, %c0_57], %119 {strides = array<i32>} : memref<8x128xf32, #tpu.memory_space<vmem>>, vector<8x128xf32>,
    %122 = arith.index_cast %87 : i32 to index
    %c0_58 = arith.constant 0 : index
    %123 = vector.load %arg7[%122, %c0_58] : memref<32x128xf32, #tpu.memory_space<vmem>>, vector<8x128xf32>
    tpu.vector_store %arg7[%122, %c0_58], %119 {strides = array<i32>} : memref<32x128xf32, #tpu.memory_space<vmem>>, vector<8x128xf32>,
    %c3_i32 = arith.constant 3 : i32
    %c8_i32_59 = arith.constant 8 : i32
    %124 = arith.muli %c3_i32, %c8_i32_59 : i32
    %125 = tpu.assume_multiple %124, 8 : i32
    %c0_60 = arith.constant 0 : index
    %c0_61 = arith.constant 0 : index
    %126 = vector.load %arg8[%c0_60, %c0_61] : memref<8x128xf32, #tpu.memory_space<vmem>>, vector<8x128xf32>
    %c0_62 = arith.constant 0 : index
    %c0_63 = arith.constant 0 : index
    %127 = vector.load %arg9[%c0_62, %c0_63] : memref<8x128xf32, #tpu.memory_space<vmem>>, vector<8x128xf32>
    %128 = arith.index_cast %125 : i32 to index
    %c0_64 = arith.constant 0 : index
    %129 = vector.load %arg10[%128, %c0_64] : memref<32x512xf32, #tpu.memory_space<vmem>>, vector<8x512xf32>
    %c0_65 = arith.constant 0 : index
    %c0_66 = arith.constant 0 : index
    %130 = vector.load %arg3[%c0_65, %c0_66] : memref<128x512xf32, #tpu.memory_space<vmem>>, vector<128x512xf32>
    %cst_67 = arith.constant dense<0.000000e+00> : vector<8x512xf32>
    %131 = tpu.matmul %126, %130, %cst_67 {dimension_numbers = #tpu.dot_dimension_numbers<[1], [0], [0], [1], [0, 0, 1, 1], [], []>} : vector<8x128xf32>, vector<128x512xf32>, vector<8x512xf32> -> vector<8x512xf32>
    %132 = arith.addf %129, %131 : vector<8x512xf32>
    %133 = vector.extract_strided_slice %132 {offsets = [0, 0], sizes = [8, 128], strides = [1, 1]} : vector<8x512xf32> to vector<8x128xf32>
    %134 = arith.negf %133 : vector<8x128xf32>
    %135 = math.exp %134 : vector<8x128xf32>
    %cst_68 = arith.constant 1.000000e+00 : f32
    %136 = vector.broadcast %cst_68 : f32 to vector<8x128xf32>
    %137 = arith.addf %136, %135 : vector<8x128xf32>
    %138 = arith.divf %136, %137 : vector<8x128xf32>
    %139 = vector.extract_strided_slice %132 {offsets = [0, 128], sizes = [8, 128], strides = [1, 1]} : vector<8x512xf32> to vector<8x128xf32>
    %140 = arith.negf %139 : vector<8x128xf32>
    %141 = math.exp %140 : vector<8x128xf32>
    %cst_69 = arith.constant 1.000000e+00 : f32
    %142 = vector.broadcast %cst_69 : f32 to vector<8x128xf32>
    %143 = arith.addf %142, %141 : vector<8x128xf32>
    %144 = arith.divf %142, %143 : vector<8x128xf32>
    %145 = vector.extract_strided_slice %132 {offsets = [0, 256], sizes = [8, 128], strides = [1, 1]} : vector<8x512xf32> to vector<8x128xf32>
    %146 = math.tanh %145 : vector<8x128xf32>
    %147 = vector.extract_strided_slice %132 {offsets = [0, 384], sizes = [8, 128], strides = [1, 1]} : vector<8x512xf32> to vector<8x128xf32>
    %148 = arith.negf %147 : vector<8x128xf32>
    %149 = math.exp %148 : vector<8x128xf32>
    %cst_70 = arith.constant 1.000000e+00 : f32
    %150 = vector.broadcast %cst_70 : f32 to vector<8x128xf32>
    %151 = arith.addf %150, %149 : vector<8x128xf32>
    %152 = arith.divf %150, %151 : vector<8x128xf32>
    %153 = arith.mulf %144, %127 : vector<8x128xf32>
    %154 = arith.mulf %138, %146 : vector<8x128xf32>
    %155 = arith.addf %153, %154 : vector<8x128xf32>
    %156 = math.tanh %155 : vector<8x128xf32>
    %157 = arith.mulf %152, %156 : vector<8x128xf32>
    %c0_71 = arith.constant 0 : index
    %c0_72 = arith.constant 0 : index
    %158 = vector.load %arg9[%c0_71, %c0_72] : memref<8x128xf32, #tpu.memory_space<vmem>>, vector<8x128xf32>
    tpu.vector_store %arg9[%c0_71, %c0_72], %155 {strides = array<i32>} : memref<8x128xf32, #tpu.memory_space<vmem>>, vector<8x128xf32>,
    %c0_73 = arith.constant 0 : index
    %c0_74 = arith.constant 0 : index
    %159 = vector.load %arg8[%c0_73, %c0_74] : memref<8x128xf32, #tpu.memory_space<vmem>>, vector<8x128xf32>
    tpu.vector_store %arg8[%c0_73, %c0_74], %157 {strides = array<i32>} : memref<8x128xf32, #tpu.memory_space<vmem>>, vector<8x128xf32>,
    %160 = arith.index_cast %125 : i32 to index
    %c0_75 = arith.constant 0 : index
    %161 = vector.load %arg7[%160, %c0_75] : memref<32x128xf32, #tpu.memory_space<vmem>>, vector<8x128xf32>
    tpu.vector_store %arg7[%160, %c0_75], %157 {strides = array<i32>} : memref<32x128xf32, #tpu.memory_space<vmem>>, vector<8x128xf32>,
    %c4_i32 = arith.constant 4 : i32
    return
  }
  func.func @transform_0(%arg0: i32) -> (i32, i32) {
    %c0_i32 = arith.constant 0 : i32
    %c0_i32_0 = arith.constant 0 : i32
    return %arg0, %c0_i32 : i32, i32
  }
  func.func @transform_1(%arg0: i32) -> (i32, i32) {
    %c0_i32 = arith.constant 0 : i32
    %c0_i32_0 = arith.constant 0 : i32
    %c0_i32_1 = arith.constant 0 : i32
    return %c0_i32, %c0_i32_0 : i32, i32
  }
  func.func @transform_2(%arg0: i32) -> (i32, i32) {
    %c0_i32 = arith.constant 0 : i32
    %c0_i32_0 = arith.constant 0 : i32
    %c0_i32_1 = arith.constant 0 : i32
    return %c0_i32, %c0_i32_0 : i32, i32
  }
  func.func @transform_3(%arg0: i32) -> (i32, i32) {
    %c0_i32 = arith.constant 0 : i32
    %c0_i32_0 = arith.constant 0 : i32
    %c0_i32_1 = arith.constant 0 : i32
    return %c0_i32, %c0_i32_0 : i32, i32
  }
  func.func @transform_4(%arg0: i32) -> (i32, i32) {
    %c0_i32 = arith.constant 0 : i32
    %c0_i32_0 = arith.constant 0 : i32
    %c0_i32_1 = arith.constant 0 : i32
    return %c0_i32, %c0_i32_0 : i32, i32
  }
  func.func @transform_5(%arg0: i32) -> (i32, i32) {
    %c0_i32 = arith.constant 0 : i32
    %c0_i32_0 = arith.constant 0 : i32
    %c0_i32_1 = arith.constant 0 : i32
    return %c0_i32, %c0_i32_0 : i32, i32
  }
  func.func @transform_6(%arg0: i32) -> (i32, i32) {
    %c0_i32 = arith.constant 0 : i32
    %c0_i32_0 = arith.constant 0 : i32
    return %arg0, %c0_i32 : i32, i32
  }
}

</mosaic_0001>

<bundles_post_ra>
// kernel: tpu_custom_call.1
= control target key start
LH: loop header
LB: loop body
LE: loop exit
PB: predicated region body
PF: predicated region fallthrough
CT: control target
= control target key end

     0   :  { %11 = vsyncpa [#allocation6], 0  ;;  %s2522_s0 = inlined_call_operand.vmem [shape: f32[64,32], index: 0, kind: input, shape index: {}]   ;;  %s2523_s1 = inlined_call_operand.hbm [shape: f32[32,512], index: 1, kind: input, shape index: {}]   ;;  %s2524_s2 = inlined_call_operand.hbm [shape: f32[128,512], index: 2, kind: input, shape index: {}]   ;;  %s2525_s3 = inlined_call_operand.vmem [shape: f32[1,512], index: 3, kind: input, shape index: {}]   ;;  %s2526_s4 = inlined_call_operand.vmem [shape: f32[8,128], index: 4, kind: input, shape index: {}]   ;;  %s2527_s5 = inlined_call_operand.vmem [shape: f32[8,128], index: 5, kind: input, shape index: {}]   ;;  %s2528_s6 = inlined_call_operand.hbm [shape: f32[64,128], index: 6, kind: output, shape index: {}]  }
   0x1   :  { %12 = vsyncpa [#allocation9], 0 }
   0x2   :  { %13 = vsyncpa [#allocation7], 0 }
   0x3   :  { %15 = vsyncpa [#allocation7 + $0x1], 0  ;;  %s1963_s21 = smov 0   ;;  %s1965_s22 = smov 0  }
   0x4   :  { %s1967_s23 = smov 0   ;;  %s1969_s24 = smov 0  }
   0x5 LB: > { %s1984_s25 = sadd.s32 4294967295, %s1918_s24   ;;  %s1628_s26 = sadd.s32 4294967294, %s1918_s24   ;;  %s1918_s24 = sphi %s1969_s24, %s2650_s24   ;;  %s1914_s23 = sphi %s1967_s23, %s2649_s23   ;;  %s1910_s22 = sphi %s1965_s22, %s2648_s22   ;;  %s1906_s21 = sphi %s1963_s21, %s2647_s21  }
   0x6   : > { %s1988_s27 = sadd.s32 1, %s1918_s24   ;;  %s159_s28 = sadd.s32 1, %s1914_s23 }
   0x7   : > { %s156_s29 = ssub.s32 %s1918_s24, %s1988_s27  ;;  %p169_p0 = scmp.ne.s32.totalorder %s1914_s23, %s1910_s22 }
   0x8   : > { %p157_p1 = scmp.eq.s32.totalorder %s156_s29, 0  ;;  %p170_p2 = scmp.eq.s32.totalorder %s1984_s25, 1 }
   0x9   : > { %p175_p3 = scmp.ne.s32.totalorder %s1910_s22, %s1906_s21  ;;  %p176_p4 = scmp.eq.s32.totalorder %s1628_s26, 1 }
   0xa   : > { %s1999_s30 = scalar_select %p157_p1, %s1914_s23, %s159_s28  }
   0xb   : > { %p2001_p5 = por %p170_p2, %p169_p0  ;;  %p2005_p6 = por %p176_p4, %p175_p3 }
   0xc   : > { %p1629_p7 = scmp.ge.s32.totalorder %s1918_s24, 1  ;;  %p183_p8 = scmp.lt.s32.totalorder %s1918_s24, 3 }
   0xd   : > { %s2561_s8 = scalar_select %p2005_p6, 1, 0 }
   0xe   : > { %p2529_p10 = scmp.eq.s32.totalorder %s1984_s25, 0  ;;  %p2013_p11 = pnand %p1629_p7, %p183_p8 }
   0xf   : > { %s1920_s10 = smov [#allocation5]   ;;  %s1921_s13 = smov [#allocation8]  }
  0x10   : > { %s195_s11 = sshll.u32 %s1920_s10, 4  ;;  %p1679_p12 = pneg %p2013_p11  ;;  %s196_s11 = int_to_ptr.vmem [resolvable:$true] %s195_s11 }
  0x11   : > { %s208_s14 = sshll.u32 %s1921_s13, 4  ;;  %s1809_s15 = scalar_lea.vmem %s196_s11, 2048  ;;  %s209_s14 = int_to_ptr.vmem [resolvable:$true] %s208_s14 }
  0x12   : > { %p2021_p13 = pnand %p2529_p10, %p1679_p12  ;;  %p1810_p1 = scmp.ne.s32.totalorder %s196_s11, %s1809_s15 }
  0x13   : > { %p1817_p4 = scmp.lt.s32.totalorder %s196_s11, %s196_s11  ;;  %p1818_p7 = scmp.lt.s32.totalorder %s1809_s15, %s1809_s15 }
  0x14   : > { %p1800_p0 = pneg %p2021_p13 }
  0x15   : > { %p1819_p8 = por %p1818_p7, %p1817_p4 }
  0x16   : > { %p1812_p2 = pnand %p1810_p1, %p1800_p0 }
  0x18   : > { %p1813_p3 = pneg %p1812_p2 }
  0x1a   : > { %p1820_p12 = pnand %p1819_p8, %p1813_p3 }
  0x1c   : > { %1823 = shalt.err (!%p1820_p12)
}
  0x1d   : > { %s1922_s16 = smov 512   ;;  %s1923_s17 = smov 32  }
  0x1e   : > { %1682 = dma.hbm_to_vmem [thread:$0]  (!%p2021_p13), %s2523_s1, 2048, %s196_s11, [#allocation6], %s1922_s16, %s1922_s16, %s1923_s17  }
  0x1f   : > { %s1835_s20 = scalar_lea.vmem %s209_s14, 8192  ;;  %p1843_p10 = scmp.lt.s32.totalorder %s209_s14, %s209_s14 }
  0x20   : > { %p1836_p9 = scmp.ne.s32.totalorder %s209_s14, %s1835_s20  ;;  %p1844_p6 = scmp.lt.s32.totalorder %s1835_s20, %s1835_s20 }
  0x22   : > { %p1838_p1 = pnand %p1836_p9, %p1800_p0  ;;  %p1845_p4 = por %p1844_p6, %p1843_p10 }
  0x24   : > { %p1839_p2 = pneg %p1838_p1 }
  0x26   : > { %p1846_p3 = pnand %p1845_p4, %p1839_p2 }
  0x28   : > { %1849 = shalt.err (!%p1846_p3)
}
  0x29   : > { %1685 = dma.hbm_to_vmem [thread:$0]  (!%p2021_p13), %s2524_s2, 8192, %s209_s14, [#allocation9], %s1922_s16, %s1922_s16, %s1923_s17  }
  0x2a   : > { %242 = sbr.rel (%p2013_p11) target bundleno = 1125 (0x465), region = 44 }
  0x2f   : > { %p2564_p7 = scmp.eq.s32.totalorder %s1984_s25, 0 }
  0x31   : > { %1893 = dma.done.wait (%p2564_p7), [#allocation6], 2048   ;;  %p2565_p9 = pmov %p2564_p7 }
  0x32   : > { %p2566_p0 = pmov %p2564_p7 }
  0x33   : > { %1895 = vsyncadd (%p2565_p9), [#allocation6], 4294965248 }
  0x34   : > { %1897 = dma.done.wait (%p2566_p0), [#allocation9], 8192   ;;  %p2567_p6 = pmov %p2566_p0 }
  0x35   : > { %s273_s29 = sand.u32 1, %s1910_s22   ;;  %s1637_s10 = sshll.u32 %s1984_s25, 2 }
  0x36   : > { %1899 = vsyncadd (%p2567_p6), [#allocation9], 4294959104  ;;  %s1636_s9 = sshll.u32 %s273_s29, 5  ;;  %p277_p10 = scmp.lt.s32.totalorder %s1637_s10, 7 }
  0x37   : > { %s2062_s15 = scalar_lea.vmem [#allocation10], %s1636_s9  ;;  %p2568_p11 = scmp.ne.s32.totalorder %s1984_s25, 0 }
  0x38   : > { %s2652_s10 = smov (!%p277_p10, %s1637_s10), 7 }
  0x39   : > { %s1638_s11 = sshll.u32 %s2652_s10, 3  ;;  %286 = sbr.rel (%p2568_p11) target bundleno = 65 (0x41), region = 56 }
  0x3a   : > { %s2060_s14 = scalar_lea.vmem %s2522_s0, %s1638_s11 }
  0x3e   : > { %v287_v0 = vld [vmem:[%s2526_s4] sm:$0xff] }
  0x3f   : > { %v289_v1 = vld [vmem:[%s2527_s5] sm:$0xff]  ;;  %288 = vst [vmem:[#allocation2] sm:$0xff] %v287_v0 }
  0x40   : > { %290 = vst [vmem:[#allocation3] sm:$0xff] %v289_v1 }
  0x41 PF: > { %v308_v2 = vld [vmem:[#allocation5 + $0x68] sm:$0xff]  ;;  %v310_v3 = vld [vmem:[#allocation5 + $0x78] sm:$0xff]  ;;  %v307_v4 = vld [vmem:[#allocation5 + $0x60] sm:$0xff]  ;;  %vm333_vm0 = vcmask 261120   ;;  %v2532_v20 = vmov 0.0   ;;  %s1668_s28 = sshll.u32 %s1984_s25, 9 }
  0x42   : > { %370 = vmatprep.subr.mxu0 %v308_v2  ;;  %459 = vmatprep.subr.mxu1 %v310_v3  ;;  %v309_v5 = vld [vmem:[#allocation5 + $0x70] sm:$0xff]  ;;  %v304_v6 = vld [vmem:[#allocation5 + $0x48] sm:$0xff]  ;;  %v306_v7 = vld [vmem:[#allocation5 + $0x58] sm:$0xff]  ;;  %s1541_s10 = sshll.u32 %s2062_s15, 4  ;;  %s2475_s12 = scalar_lea.hbm %s2528_s6, %s1668_s28  ;;  %s2477_s10 = int_to_ptr.vmem [resolvable:$true] %s1541_s10 }
  0x43   : > { %371 = vmatpush1.msra.mxu0 %v307_v4  ;;  %460 = vmatpush1.msra.mxu1 %v309_v5  ;;  %v303_v8 = vld [vmem:[#allocation5 + $0x40] sm:$0xff]  ;;  %v305_v9 = vld [vmem:[#allocation5 + $0x50] sm:$0xff]  ;;  %v300_v10 = vld [vmem:[#allocation5 + $0x28] sm:$0xff]  ;;  %s2482_s13 = scalar_lea.sflag [#allocation7], %s273_s29  ;;  %s1850_s25 = scalar_lea.vmem %s2477_s10, 512 }
  0x44   : > { %372 = vmatprep.subr.mxu0 %v304_v6  ;;  %461 = vmatprep.subr.mxu1 %v306_v7  ;;  %v302_v11 = vld [vmem:[#allocation5 + $0x38] sm:$0xff]  ;;  %v299_v12 = vld [vmem:[#allocation5 + $0x20] sm:$0xff]  ;;  %v301_v13 = vld [vmem:[#allocation5 + $0x30] sm:$0xff]  ;;  %p1851_p13 = scmp.ne.s32.totalorder %s2477_s10, %s1850_s25 }
  0x45   : > { %373 = vmatpush1.msra.mxu0 %v303_v8  ;;  %462 = vmatpush1.msra.mxu1 %v305_v9  ;;  %v296_v14 = vld [vmem:[#allocation5 + $0x8] sm:$0xff]  ;;  %v298_v15 = vld [vmem:[#allocation5 + $0x18] sm:$0xff]  ;;  %v295_v16 = vld [vmem:[#allocation5] sm:$0xff] }
  0x46   : > { %374 = vmatprep.subr.mxu0 %v300_v10  ;;  %463 = vmatprep.subr.mxu1 %v302_v11  ;;  %v297_v17 = vld [vmem:[#allocation5 + $0x10] sm:$0xff]  ;;  %v2073_v19 = vld [vmem:[#allocation8 + $0x1e8] sm:$0xff]  ;;  %v2076_v21 = vld [vmem:[#allocation8 + $0x1f8] sm:$0xff]  ;;  %p1852_p8 = pnand %p1851_p13, %p2001_p5 }
  0x47   : > { %375 = vmatpush1.msra.mxu0 %v299_v12  ;;  %464 = vmatpush1.msra.mxu1 %v301_v13  ;;  %v291_v18 = vld [vmem:[%s2060_s14] sm:$0xff]  ;;  %v2079_v22 = vld [vmem:[#allocation8 + $0x1e0] sm:$0xff]  ;;  %v2085_v24 = vld [vmem:[#allocation8 + $0x1c8] sm:$0xff] }
  0x48   : > { %376 = vmatprep.subr.mxu0 %v296_v14  ;;  %465 = vmatprep.subr.mxu1 %v298_v15  ;;  %v2081_v23 = vld [vmem:[#allocation8 + $0x1f0] sm:$0xff]  ;;  %v2087_v25 = vld [vmem:[#allocation8 + $0x1d8] sm:$0xff]  ;;  %v2091_v26 = vld [vmem:[#allocation8 + $0x1c0] sm:$0xff]  ;;  %p1853_p12 = pneg %p1852_p8 }
  0x49   : > { %377 = vmatpush1.msra.mxu0 %v295_v16  ;;  %410 = vmatprep.mubr.f32.mxu0 %v2532_v20  ;;  %v2093_v27 = vld [vmem:[#allocation8 + $0x1d0] sm:$0xff]  ;;  %v2097_v28 = vld [vmem:[#allocation8 + $0x1a8] sm:$0xff]  ;;  %v2099_v29 = vld [vmem:[#allocation8 + $0x1b8] sm:$0xff] }
  0x4a   : > { %466 = vmatpush1.msra.mxu1 %v297_v17  ;;  %1640 = vmatmul.mubr.msk.f32.vlgmr.msra.gmra.mxu0 %vm333_vm0, %v291_v18  ;;  %v2103_v30 = vld [vmem:[#allocation8 + $0x1a0] sm:$0xff]  ;;  %v2105_v31 = vld [vmem:[#allocation8 + $0x1b0] sm:$0xff]  ;;  %v2109_v32 = vld [vmem:[#allocation8 + $0x188] sm:$0xff] }
  0x4b   : > { %499 = vmatprep.mubr.f32.mxu1 %v2532_v20  ;;  %613 = vmatprep.subr.mxu0 %v2073_v19  ;;  %v2111_v33 = vld [vmem:[#allocation8 + $0x198] sm:$0xff]  ;;  %v2115_v34 = vld [vmem:[#allocation8 + $0x180] sm:$0xff]  ;;  %v2117_v35 = vld [vmem:[#allocation8 + $0x190] sm:$0xff] }
  0x4c   : > { %684 = vmatprep.subr.mxu1 %v2076_v21  ;;  %1644 = vmatmul.mubr.msk.f32.vlgmr.msra.gmra.mxu1 %vm333_vm0, %v291_v18  ;;  %v2121_v36 = vld [vmem:[#allocation8 + $0x168] sm:$0xff]  ;;  %v2123_v37 = vld [vmem:[#allocation8 + $0x178] sm:$0xff]  ;;  %v2127_v38 = vld [vmem:[#allocation8 + $0x160] sm:$0xff] }
  0x4d   : > { %614 = vmatpush1.msra.mxu0 %v2079_v22  ;;  %685 = vmatpush1.msra.mxu1 %v2081_v23  ;;  %v2129_v39 = vld [vmem:[#allocation8 + $0x170] sm:$0xff]  ;;  %v2133_v40 = vld [vmem:[#allocation8 + $0x148] sm:$0xff]  ;;  %v2135_v41 = vld [vmem:[#allocation8 + $0x158] sm:$0xff] }
  0x4e   : > { %615 = vmatprep.subr.mxu0 %v2085_v24  ;;  %686 = vmatprep.subr.mxu1 %v2087_v25  ;;  %v2139_v42 = vld [vmem:[#allocation8 + $0x140] sm:$0xff]  ;;  %v2141_v43 = vld [vmem:[#allocation8 + $0x150] sm:$0xff]  ;;  %v2145_v44 = vld [vmem:[#allocation8 + $0x128] sm:$0xff] }
  0x4f   : > { %616 = vmatpush1.msra.mxu0 %v2091_v26  ;;  %687 = vmatpush1.msra.mxu1 %v2093_v27  ;;  %v2147_v45 = vld [vmem:[#allocation8 + $0x138] sm:$0xff]  ;;  %v2151_v46 = vld [vmem:[#allocation8 + $0x120] sm:$0xff]  ;;  %v2153_v47 = vld [vmem:[#allocation8 + $0x130] sm:$0xff] }
  0x50   : > { %617 = vmatprep.subr.mxu0 %v2097_v28  ;;  %688 = vmatprep.subr.mxu1 %v2099_v29  ;;  %v2157_v48 = vld [vmem:[#allocation8 + $0x108] sm:$0xff]  ;;  %v2159_v49 = vld [vmem:[#allocation8 + $0x118] sm:$0xff]  ;;  %v2163_v50 = vld [vmem:[#allocation8 + $0x100] sm:$0xff] }
  0x51   : > { %618 = vmatpush1.msra.mxu0 %v2103_v30  ;;  %689 = vmatpush1.msra.mxu1 %v2105_v31  ;;  %v2165_v51 = vld [vmem:[#allocation8 + $0x110] sm:$0xff]  ;;  %v2169_v52 = vld [vmem:[#allocation8 + $0xe8] sm:$0xff]  ;;  %v2171_v53 = vld [vmem:[#allocation8 + $0xf8] sm:$0xff] }
  0x52   : > { %619 = vmatprep.subr.mxu0 %v2109_v32  ;;  %690 = vmatprep.subr.mxu1 %v2111_v33  ;;  %v2175_v54 = vld [vmem:[#allocation8 + $0xe0] sm:$0xff]  ;;  %v2179_v55 = vld [vmem:[#allocation8 + $0xf0] sm:$0xff]  ;;  %v292_v56 = vld [vmem:[%s2060_s14 + $0x8] sm:$0xff] }
  0x53   : > { %620 = vmatpush1.msra.mxu0 %v2115_v34  ;;  %691 = vmatpush1.msra.mxu1 %v2117_v35  ;;  %v2184_v57 = vld [vmem:[#allocation8 + $0xc8] sm:$0xff]  ;;  %v2186_v58 = vld [vmem:[#allocation8 + $0xd8] sm:$0xff]  ;;  %v2190_v59 = vld [vmem:[#allocation8 + $0xc0] sm:$0xff] }
  0x54   : > { %621 = vmatprep.subr.mxu0 %v2121_v36  ;;  %692 = vmatprep.subr.mxu1 %v2123_v37  ;;  %v2194_v60 = vld [vmem:[#allocation8 + $0xd0] sm:$0xff]  ;;  %v2196_v61 = vld [vmem:[#allocation8 + $0xa8] sm:$0xff]  ;;  %v2200_v62 = vld [vmem:[#allocation8 + $0xb8] sm:$0xff] }
  0x55   : > { %622 = vmatpush1.msra.mxu0 %v2127_v38  ;;  %693 = vmatpush1.msra.mxu1 %v2129_v39  ;;  %2569 = vst [vmem:[#allocation14_spill] sm:$0xff] %v2196_v61  ;;  %2570 = vst [vmem:[#allocation15_spill] sm:$0xff] %v2200_v62  ;;  %v2204_v63 = vld [vmem:[#allocation8 + $0xa0] sm:$0xff]  ;;  %v2208_v0 = vld [vmem:[#allocation8 + $0xb0] sm:$0xff] }
  0x56   : > { %623 = vmatprep.subr.mxu0 %v2133_v40  ;;  %694 = vmatprep.subr.mxu1 %v2135_v41  ;;  %2571 = vst [vmem:[#allocation16_spill] sm:$0xff] %v2204_v63  ;;  %2572 = vst [vmem:[#allocation17_spill] sm:$0xff] %v2208_v0  ;;  %v293_v1 = vld [vmem:[%s2060_s14 + $0x10] sm:$0xff]  ;;  %v2213_v2 = vld [vmem:[#allocation8 + $0x88] sm:$0xff] }
  0x57   : > { %624 = vmatpush1.msra.mxu0 %v2139_v42  ;;  %695 = vmatpush1.msra.mxu1 %v2141_v43  ;;  %2573 = vst [vmem:[#allocation18_spill] sm:$0xff] %v2213_v2  ;;  %v2215_v3 = vld [vmem:[#allocation8 + $0x98] sm:$0xff]  ;;  %v2219_v4 = vld [vmem:[#allocation8 + $0x80] sm:$0xff]  ;;  %v2223_v5 = vld [vmem:[#allocation8 + $0x90] sm:$0xff] }
  0x58   : > { %625 = vmatprep.subr.mxu0 %v2145_v44  ;;  %696 = vmatprep.subr.mxu1 %v2147_v45  ;;  %2574 = vst [vmem:[#allocation19_spill] sm:$0xff] %v2215_v3  ;;  %2575 = vst [vmem:[#allocation20_spill] sm:$0xff] %v2219_v4  ;;  %v2225_v6 = vld [vmem:[#allocation8 + $0x68] sm:$0xff]  ;;  %v2229_v7 = vld [vmem:[#allocation8 + $0x78] sm:$0xff] }
  0x59   : > { %626 = vmatpush1.msra.mxu0 %v2151_v46  ;;  %697 = vmatpush1.msra.mxu1 %v2153_v47  ;;  %2576 = vst [vmem:[#allocation21_spill] sm:$0xff] %v2223_v5  ;;  %2577 = vst [vmem:[#allocation22_spill] sm:$0xff] %v2225_v6  ;;  %v2233_v8 = vld [vmem:[#allocation8 + $0x60] sm:$0xff]  ;;  %v2237_v9 = vld [vmem:[#allocation8 + $0x70] sm:$0xff] }
  0x5a   : > { %627 = vmatprep.subr.mxu0 %v2157_v48  ;;  %698 = vmatprep.subr.mxu1 %v2159_v49  ;;  %2578 = vst [vmem:[#allocation23_spill] sm:$0xff] %v2229_v7  ;;  %2579 = vst [vmem:[#allocation24_spill] sm:$0xff] %v2233_v8  ;;  %v294_v10 = vld [vmem:[%s2060_s14 + $0x18] sm:$0xff]  ;;  %v2244_v12 = vld [vmem:[#allocation8 + $0x58] sm:$0xff]  ;;  %s1925_s14 = smov [#allocation10]  }
  0x5b   : > { %628 = vmatpush1.msra.mxu0 %v2163_v50  ;;  %699 = vmatpush1.msra.mxu1 %v2165_v51  ;;  %2580 = vst [vmem:[#allocation25_spill] sm:$0xff] %v2237_v9  ;;  %v2242_v11 = vld [vmem:[#allocation8 + $0x48] sm:$0xff]  ;;  %2582 = vst [vmem:[#allocation27_spill] sm:$0xff] %v2244_v12  ;;  %v2248_v13 = vld [vmem:[#allocation8 + $0x40] sm:$0xff]  ;;  %s1854_s16 = sshll.u32 %s1925_s14, 4  ;;  %s1855_s16 = int_to_ptr.vmem [resolvable:$false] %s1854_s16 }
  0x5c   : > { %629 = vmatprep.subr.mxu0 %v2169_v52  ;;  %700 = vmatprep.subr.mxu1 %v2171_v53  ;;  %2581 = vst [vmem:[#allocation26_spill] sm:$0xff] %v2242_v11  ;;  %2583 = vst [vmem:[#allocation28_spill] sm:$0xff] %v2248_v13  ;;  %v2252_v14 = vld [vmem:[#allocation8 + $0x50] sm:$0xff]  ;;  %v2254_v15 = vld [vmem:[#allocation8 + $0x28] sm:$0xff]  ;;  %s1856_s17 = scalar_lea.vmem %s1855_s16, 1024  ;;  %p1857_p1 = scmp.lt.s32.totalorder %s2477_s10, %s1855_s16 }
  0x5d   : > { %416 = vmatprep.mubr.f32.mxu0 %v2532_v20  ;;  %630 = vmatpush1.msra.mxu0 %v2175_v54  ;;  %2584 = vst [vmem:[#allocation29_spill] sm:$0xff] %v2252_v14  ;;  %2585 = vst [vmem:[#allocation30_spill] sm:$0xff] %v2254_v15  ;;  %v2258_v16 = vld [vmem:[#allocation8 + $0x38] sm:$0xff]  ;;  %v2262_v17 = vld [vmem:[#allocation8 + $0x20] sm:$0xff]  ;;  %p1858_p2 = scmp.lt.s32.totalorder %s1856_s17, %s1850_s25 }
  0x5e   : > { %701 = vmatpush1.msra.mxu1 %v2179_v55  ;;  %1641 = vmatmul.mubr.msk.f32.gmra.mxu0 %vm333_vm0, %v292_v56  ;;  %2586 = vst [vmem:[#allocation31_spill] sm:$0xff] %v2258_v16  ;;  %2587 = vst [vmem:[#allocation32_spill] sm:$0xff] %v2262_v17  ;;  %v2264_v18 = vld [vmem:[#allocation8 + $0x30] sm:$0xff] }
  0x5f   : > { %631 = vmatprep.subr.mxu0 %v2184_v57  ;;  %702 = vmatprep.subr.mxu1 %v2186_v58  ;;  %2588 = vst [vmem:[#allocation33_spill] sm:$0xff] %v2264_v18  ;;  %p1859_p4 = por %p1858_p2, %p1857_p1 }
  0x60   : > { %505 = vmatprep.mubr.f32.mxu1 %v2532_v20  ;;  %632 = vmatpush1.msra.mxu0 %v2190_v59 }
  0x61   : > { %703 = vmatpush1.msra.mxu1 %v2194_v60  ;;  %633 = vmatprep.subr.mxu0 %v2196_v61  ;;  %p1860_p3 = pnand %p1859_p4, %p1853_p12 }
  0x62   : > { %1645 = vmatmul.mubr.msk.f32.gmra.mxu1 %vm333_vm0, %v292_v56  ;;  %704 = vmatprep.subr.mxu1 %v2200_v62  ;;  %v2268_v56 = vld [vmem:[#allocation8 + $0x8] sm:$0xff] }
  0x63   : > { %422 = vmatprep.mubr.f32.mxu0 %v2532_v20  ;;  %634 = vmatpush1.msra.mxu0 %v2204_v63  ;;  %2589 = vst [vmem:[#allocation34_spill] sm:$0xff] %v2268_v56 }
  0x64   : > { %705 = vmatpush1.msra.mxu1 %v2208_v0  ;;  %1642 = vmatmul.mubr.msk.f32.gmra.mxu0 %vm333_vm0, %v293_v1 }
  0x65   : > { %635 = vmatprep.subr.mxu0 %v2213_v2  ;;  %706 = vmatprep.subr.mxu1 %v2215_v3 }
  0x66   : > { %511 = vmatprep.mubr.f32.mxu1 %v2532_v20  ;;  %636 = vmatpush1.msra.mxu0 %v2219_v4 }
  0x67   : > { %707 = vmatpush1.msra.mxu1 %v2223_v5  ;;  %637 = vmatprep.subr.mxu0 %v2225_v6 }
  0x68   : > { %1646 = vmatmul.mubr.msk.f32.gmra.mxu1 %vm333_vm0, %v293_v1  ;;  %708 = vmatprep.subr.mxu1 %v2229_v7  ;;  %v2270_v1 = vld [vmem:[#allocation8 + $0x18] sm:$0xff] }
  0x69   : > { %428 = vmatprep.mubr.f32.mxu0 %v2532_v20  ;;  %638 = vmatpush1.msra.mxu0 %v2233_v8  ;;  %2590 = vst [vmem:[#allocation35_spill] sm:$0xff] %v2270_v1 }
  0x6a   : > { %709 = vmatpush1.msra.mxu1 %v2237_v9  ;;  %1643 = vmatmul.mubr.msk.f32.gmra.mxu0 %vm333_vm0, %v294_v10 }
  0x6b   : > { %639 = vmatprep.subr.mxu0 %v2242_v11  ;;  %710 = vmatprep.subr.mxu1 %v2244_v12  ;;  %v2274_v12 = vld [vmem:[#allocation8] sm:$0xff] }
  0x6c   : > { %517 = vmatprep.mubr.f32.mxu1 %v2532_v20  ;;  %640 = vmatpush1.msra.mxu0 %v2248_v13  ;;  %2591 = vst [vmem:[#allocation36_spill] sm:$0xff] %v2274_v12  ;;  %v2278_v20 = vld [vmem:[#allocation8 + $0x10] sm:$0xff] }
  0x6d   : > { %711 = vmatpush1.msra.mxu1 %v2252_v14  ;;  %641 = vmatprep.subr.mxu0 %v2254_v15  ;;  %2592 = vst [vmem:[#allocation37_spill] sm:$0xff] %v2278_v20  ;;  %v540_v15 = vld [vmem:[#allocation2] sm:$0xff]  ;;  %v2593_v14 = vmov 0.0  }
  0x6e   : > { %1647 = vmatmul.mubr.msk.f32.gmra.mxu1 %vm333_vm0, %v294_v10  ;;  %712 = vmatprep.subr.mxu1 %v2258_v16  ;;  %v2594_v10 = vld [vmem:[#allocation27_spill] sm:$0xff] }
  0x6f   : > { %642 = vmatpush1.msra.mxu0 %v2262_v17  ;;  %713 = vmatpush1.msra.mxu1 %v2264_v18 }
  0x70   : > { %643 = vmatprep.subr.mxu0 %v2268_v56  ;;  %714 = vmatprep.subr.mxu1 %v2270_v1 }
  0x71   : > { %644 = vmatpush1.msra.mxu0 %v2274_v12  ;;  %677 = vmatprep.mubr.f32.mxu0 %v2593_v14 }
  0x72   : > { %715 = vmatpush1.msra.mxu1 %v2278_v20  ;;  %748 = vmatprep.mubr.f32.mxu1 %v2593_v14 }
  0x73   : > { %678 = vmatmul.mubr.f32.vlgmr.msra.gmra.mxu0 %v540_v15  ;;  %749 = vmatmul.mubr.f32.vlgmr.msra.gmra.mxu1 %v540_v15  ;;  %v2595_v15 = vld [vmem:[#allocation29_spill] sm:$0xff] }
  0x74   : > { %859 = vmatprep.subr.mxu0 %v2073_v19  ;;  %930 = vmatprep.subr.mxu1 %v2076_v21 }
  0x75   : > { %860 = vmatpush1.msra.mxu0 %v2079_v22  ;;  %931 = vmatpush1.msra.mxu1 %v2081_v23 }
  0x76   : > { %861 = vmatprep.subr.mxu0 %v2085_v24  ;;  %932 = vmatprep.subr.mxu1 %v2087_v25 }
  0x77   : > { %862 = vmatpush1.msra.mxu0 %v2091_v26  ;;  %933 = vmatpush1.msra.mxu1 %v2093_v27 }
  0x78   : > { %863 = vmatprep.subr.mxu0 %v2097_v28  ;;  %934 = vmatprep.subr.mxu1 %v2099_v29 }
  0x79   : > { %864 = vmatpush1.msra.mxu0 %v2103_v30  ;;  %935 = vmatpush1.msra.mxu1 %v2105_v31 }
  0x7a   : > { %865 = vmatprep.subr.mxu0 %v2109_v32  ;;  %936 = vmatprep.subr.mxu1 %v2111_v33 }
  0x7b   : > { %866 = vmatpush1.msra.mxu0 %v2115_v34  ;;  %937 = vmatpush1.msra.mxu1 %v2117_v35 }
  0x7c   : > { %867 = vmatprep.subr.mxu0 %v2121_v36  ;;  %938 = vmatprep.subr.mxu1 %v2123_v37 }
  0x7d   : > { %868 = vmatpush1.msra.mxu0 %v2127_v38  ;;  %939 = vmatpush1.msra.mxu1 %v2129_v39 }
  0x7e   : > { %869 = vmatprep.subr.mxu0 %v2133_v40  ;;  %940 = vmatprep.subr.mxu1 %v2135_v41 }
  0x7f   : > { %870 = vmatpush1.msra.mxu0 %v2139_v42  ;;  %941 = vmatpush1.msra.mxu1 %v2141_v43 }
  0x80   : > { %871 = vmatprep.subr.mxu0 %v2145_v44  ;;  %942 = vmatprep.subr.mxu1 %v2147_v45 }
  0x81   : > { %872 = vmatpush1.msra.mxu0 %v2151_v46  ;;  %943 = vmatpush1.msra.mxu1 %v2153_v47 }
  0x82   : > { %873 = vmatprep.subr.mxu0 %v2157_v48  ;;  %944 = vmatprep.subr.mxu1 %v2159_v49 }
  0x83   : > { %874 = vmatpush1.msra.mxu0 %v2163_v50  ;;  %945 = vmatpush1.msra.mxu1 %v2165_v51 }
  0x84   : > { %875 = vmatprep.subr.mxu0 %v2169_v52  ;;  %946 = vmatprep.subr.mxu1 %v2171_v53 }
  0x85   : > { %876 = vmatpush1.msra.mxu0 %v2175_v54  ;;  %947 = vmatpush1.msra.mxu1 %v2179_v55 }
  0x86   : > { %877 = vmatprep.subr.mxu0 %v2184_v57  ;;  %948 = vmatprep.subr.mxu1 %v2186_v58 }
  0x87   : > { %878 = vmatpush1.msra.mxu0 %v2190_v59  ;;  %949 = vmatpush1.msra.mxu1 %v2194_v60 }
  0x88   : > { %879 = vmatprep.subr.mxu0 %v2196_v61  ;;  %950 = vmatprep.subr.mxu1 %v2200_v62 }
  0x89   : > { %880 = vmatpush1.msra.mxu0 %v2204_v63  ;;  %951 = vmatpush1.msra.mxu1 %v2208_v0 }
  0x8a   : > { %881 = vmatprep.subr.mxu0 %v2213_v2  ;;  %952 = vmatprep.subr.mxu1 %v2215_v3  ;;  %v2596_v3 = vld [vmem:[#allocation30_spill] sm:$0xff] }
  0x8b   : > { %882 = vmatpush1.msra.mxu0 %v2219_v4  ;;  %953 = vmatpush1.msra.mxu1 %v2223_v5 }
  0x8c   : > { %883 = vmatprep.subr.mxu0 %v2225_v6  ;;  %954 = vmatprep.subr.mxu1 %v2229_v7 }
  0x8d   : > { %884 = vmatpush1.msra.mxu0 %v2233_v8  ;;  %955 = vmatpush1.msra.mxu1 %v2237_v9 }
  0x8e   : > { %885 = vmatprep.subr.mxu0 %v2242_v11  ;;  %956 = vmatprep.subr.mxu1 %v2594_v10 }
  0x8f   : > { %886 = vmatpush1.msra.mxu0 %v2248_v13  ;;  %957 = vmatpush1.msra.mxu1 %v2595_v15 }
  0x90   : > { %887 = vmatprep.subr.mxu0 %v2596_v3  ;;  %958 = vmatprep.subr.mxu1 %v2258_v16  ;;  %v313_v16 = vlaneseq }
  0x91   : > { %888 = vmatpush1.msra.mxu0 %v2262_v17  ;;  %959 = vmatpush1.msra.mxu1 %v2264_v18 }
  0x92   : > { %889 = vmatprep.subr.mxu0 %v2268_v56  ;;  %960 = vmatprep.subr.mxu1 %v2270_v1  ;;  %v314_v17 = vshrl.u32 %v313_v16, 7  ;;  %v311_v1 = vld [vmem:[%s2525_s3] sm:$0xf] }
  0x93   : > { %890 = vmatpush1.msra.mxu0 %v2274_v12  ;;  %923 = vmatprep.mubr.f32.mxu0 %v2593_v14 }
  0x94   : > { %961 = vmatpush1.msra.mxu1 %v2278_v20  ;;  %994 = vmatprep.mubr.f32.mxu1 %v2593_v14  ;;  %v315_v18 = vsub.s32 0, %v314_v17  ;;  %v319_v12 = vsub.s32 1, %v314_v17  ;;  %v323_v10 = vsub.s32 2, %v314_v17 }
  0x95   : > { %1106 = vmatprep.subr.mxu0 %v2073_v19  ;;  %1177 = vmatprep.subr.mxu1 %v2076_v21  ;;  %v327_v19 = vsub.s32 3, %v314_v17 }
  0x96   : > { %v316_v13 = vrot.slane %v311_v1, %v315_v18  ;;  %v320_v14 = vrot.slane %v311_v1, %v319_v12  ;;  %v324_v8 = vrot.slane %v311_v1, %v323_v10 }
  0x97   : > { %v328_v6 = vrot.slane %v311_v1, %v327_v19 }
 0x10a   : > { %v412_v3 = vpop.f32.mrf.mxu0 }
 0x10c   : > { %v501_v56 = vpop.f32.mrf.mxu1  ;;  %v414_v15 = vpop.f32.mrf.mxu0 }
 0x10e   : > { %v503_v11 = vpop.f32.mrf.mxu1 }
 0x11e   : > { %v418_v20 = vpop.f32.mrf.mxu0 }
 0x11f   : > { %v2357_v9 = vadd.f32 %v418_v20, %v316_v13 }
 0x120   : > { %v420_v21 = vpop.f32.mrf.mxu0 }
 0x121   : > { %2597 = vst [vmem:[#allocation38_spill] sm:$0xff] %v2357_v9  ;;  %v2359_v16 = vadd.f32 %v420_v21, %v320_v14 }
 0x122   : > { %v507_v7 = vpop.f32.mrf.mxu1 }
 0x123   : > { %2598 = vst [vmem:[#allocation39_spill] sm:$0xff] %v2359_v16  ;;  %v2361_v5 = vadd.f32 %v507_v7, %v324_v8 }
 0x124   : > { %v424_v4 = vpop.f32.mrf.mxu0  ;;  %v509_v2 = vpop.f32.mrf.mxu1 }
 0x125   : > { %2599 = vst [vmem:[#allocation40_spill] sm:$0xff] %v2361_v5  ;;  %v2363_v0 = vadd.f32 %v424_v4, %v316_v13  ;;  %v2365_v18 = vadd.f32 %v509_v2, %v328_v6  ;;  %v415_v5 = vadd.f32 %v414_v15, %v320_v14 }
 0x126   : > { %v426_v63 = vpop.f32.mrf.mxu0 }
 0x127   : > { %2600 = vst [vmem:[#allocation41_spill] sm:$0xff] %v2363_v0  ;;  %2601 = vst [vmem:[#allocation42_spill] sm:$0xff] %v2365_v18  ;;  %v2367_v62 = vadd.f32 %v426_v63, %v320_v14  ;;  %v413_v63 = vadd.f32 %v412_v3, %v316_v13 }
 0x128   : > { %v513_v20 = vpop.f32.mrf.mxu1 }
 0x129   : > { %2602 = vst [vmem:[#allocation43_spill] sm:$0xff] %v2367_v62  ;;  %v2369_v12 = vadd.f32 %v513_v20, %v324_v8 }
 0x12a   : > { %v430_v17 = vpop.f32.mrf.mxu0  ;;  %v515_v10 = vpop.f32.mrf.mxu1 }
 0x12b   : > { %2603 = vst [vmem:[#allocation44_spill] sm:$0xff] %v2369_v12  ;;  %v2371_v21 = vadd.f32 %v430_v17, %v316_v13  ;;  %v2373_v16 = vadd.f32 %v515_v10, %v328_v6  ;;  %v541_v13 = vld [vmem:[#allocation3] sm:$0xff] }
 0x12c   : > { %v432_v7 = vpop.f32.mrf.mxu0 }
 0x12d   : > { %2604 = vst [vmem:[#allocation45_spill] sm:$0xff] %v2371_v21  ;;  %2605 = vst [vmem:[#allocation46_spill] sm:$0xff] %v2373_v16  ;;  %v2375_v1 = vadd.f32 %v432_v7, %v320_v14  ;;  %v504_v7 = vadd.f32 %v503_v11, %v328_v6  ;;  %v502_v16 = vadd.f32 %v501_v56, %v324_v8 }
 0x12e   : > { %v519_v19 = vpop.f32.mrf.mxu1 }
 0x12f   : > { %2606 = vst [vmem:[#allocation47_spill] sm:$0xff] %v2375_v1  ;;  %v2377_v4 = vadd.f32 %v519_v19, %v324_v8 }
 0x130   : > { %v521_v2 = vpop.f32.mrf.mxu1 }
 0x131   : > { %2607 = vst [vmem:[#allocation48_spill] sm:$0xff] %v2377_v4  ;;  %v2379_v0 = vadd.f32 %v521_v2, %v328_v6 }
 0x133   : > { %2608 = vst [vmem:[#allocation49_spill] sm:$0xff] %v2379_v0  ;;  %v679_v62 = vpop.f32.mrf.mxu0  ;;  %v750_v17 = vpop.f32.mrf.mxu1 }
 0x134   : > { %v755_v20 = vadd.f32 %v679_v62, %v413_v63  ;;  %v757_v61 = vadd.f32 %v750_v17, %v502_v16 }
 0x135   : > { %v681_v12 = vpop.f32.mrf.mxu0  ;;  %v752_v21 = vpop.f32.mrf.mxu1 }
 0x136   : > { %v1648_v18 = vmul.f32 -1.442695, %v755_v20  ;;  %v756_v9 = vadd.f32 %v681_v12, %v415_v5  ;;  %v758_v1 = vadd.f32 %v752_v21, %v504_v7 }
 0x138   : > { %1734 = vpow2.f32 %v1648_v18  ;;  %v1649_v10 = vmul.f32 -1.442695, %v756_v9  ;;  %v1650_v19 = vmul.f32 -1.442695, %v758_v1 }
 0x13a   : > { %1736 = vpow2.f32 %v1649_v10 }
 0x13b   : > { %1738 = vpow2.f32 %v1650_v19 }
 0x145   : > { %v1735_v4 = vpop.eup %1734 }
 0x146   : > { %v762_v2 = vadd.f32 1.0, %v1735_v4 }
 0x147   : > { %v1737_v0 = vpop.eup %1736 }
 0x148   : > { %1740 = vrcp.f32 %v762_v2  ;;  %v768_v3 = vadd.f32 1.0, %v1737_v0  ;;  %v1739_v62 = vpop.eup %1738 }
 0x149   : > { %1742 = vtanh.f32 %v757_v61  ;;  %v775_v15 = vadd.f32 1.0, %v1739_v62 }
 0x14a   : > { %1744 = vrcp.f32 %v768_v3 }
 0x14b   : > { %1746 = vrcp.f32 %v775_v15  ;;  %v1349_v15 = vld [vmem:[#allocation8 + $0x1e0] sm:$0xff] }
 0x155   : > { %v1741_v5 = vpop.eup %1740 }
 0x156   : > { %v1743_v9 = vpop.eup %1742 }
 0x157   : > { %v1745_v14 = vpop.eup %1744  ;;  %v779_v6 = vmul.f32 %v1743_v9, %v1741_v5  ;;  %v1350_v9 = vld [vmem:[#allocation8 + $0x1e8] sm:$0xff] }
 0x158   : > { %v778_v11 = vmul.f32 %v1745_v14, %v541_v13  ;;  %v1747_v56 = vpop.eup %1746  ;;  %v1352_v14 = vld [vmem:[#allocation8 + $0x1f8] sm:$0xff] }
 0x15a   : > { %v2381_v8 = vadd.f32 %v779_v6, %v778_v11  ;;  %v1351_v6 = vld [vmem:[#allocation8 + $0x1f0] sm:$0xff]  ;;  %v1346_v11 = vld [vmem:[#allocation8 + $0x1c8] sm:$0xff] }
 0x15c   : > { %1748 = vtanh.f32 %v2381_v8 }
 0x169   : > { %v1749_v16 = vpop.eup %1748 }
 0x16a   : > { %v782_v18 = vmul.f32 %v1749_v16, %v1747_v56  ;;  %v1345_v56 = vld [vmem:[#allocation8 + $0x1c0] sm:$0xff]  ;;  %v1347_v16 = vld [vmem:[#allocation8 + $0x1d0] sm:$0xff] }
 0x16c   : > { %785 = vst [vmem:[%s2062_s15] sm:$0xff] %v782_v18  ;;  %924 = vmatmul.mubr.f32.vlgmr.msra.gmra.mxu0 %v782_v18  ;;  %995 = vmatmul.mubr.f32.vlgmr.msra.gmra.mxu1 %v782_v18  ;;  %v1342_v18 = vld [vmem:[#allocation8 + $0x1a8] sm:$0xff] }
 0x16d   : > { %1107 = vmatpush1.msra.mxu0 %v2079_v22  ;;  %1178 = vmatpush1.msra.mxu1 %v2081_v23  ;;  %v2609_v22 = vld [vmem:[#allocation14_spill] sm:$0xff]  ;;  %v2610_v23 = vld [vmem:[#allocation15_spill] sm:$0xff] }
 0x16e   : > { %1108 = vmatprep.subr.mxu0 %v2085_v24  ;;  %1179 = vmatprep.subr.mxu1 %v2087_v25  ;;  %v2611_v24 = vld [vmem:[#allocation16_spill] sm:$0xff]  ;;  %v2612_v25 = vld [vmem:[#allocation17_spill] sm:$0xff] }
 0x16f   : > { %1109 = vmatpush1.msra.mxu0 %v2091_v26  ;;  %1180 = vmatpush1.msra.mxu1 %v2093_v27  ;;  %v2613_v26 = vld [vmem:[#allocation18_spill] sm:$0xff]  ;;  %v2614_v27 = vld [vmem:[#allocation19_spill] sm:$0xff] }
 0x170   : > { %1110 = vmatprep.subr.mxu0 %v2097_v28  ;;  %1181 = vmatprep.subr.mxu1 %v2099_v29  ;;  %v2615_v28 = vld [vmem:[#allocation20_spill] sm:$0xff]  ;;  %v2616_v29 = vld [vmem:[#allocation21_spill] sm:$0xff] }
 0x171   : > { %1111 = vmatpush1.msra.mxu0 %v2103_v30  ;;  %1182 = vmatpush1.msra.mxu1 %v2105_v31  ;;  %v2617_v30 = vld [vmem:[#allocation22_spill] sm:$0xff]  ;;  %v2618_v31 = vld [vmem:[#allocation23_spill] sm:$0xff] }
 0x172   : > { %1112 = vmatprep.subr.mxu0 %v2109_v32  ;;  %1183 = vmatprep.subr.mxu1 %v2111_v33  ;;  %v2619_v32 = vld [vmem:[#allocation24_spill] sm:$0xff]  ;;  %v2620_v33 = vld [vmem:[#allocation25_spill] sm:$0xff] }
 0x173   : > { %1113 = vmatpush1.msra.mxu0 %v2115_v34  ;;  %1184 = vmatpush1.msra.mxu1 %v2117_v35  ;;  %v2621_v34 = vld [vmem:[#allocation26_spill] sm:$0xff]  ;;  %v2622_v35 = vld [vmem:[#allocation27_spill] sm:$0xff] }
 0x174   : > { %1114 = vmatprep.subr.mxu0 %v2121_v36  ;;  %1185 = vmatprep.subr.mxu1 %v2123_v37  ;;  %v2623_v36 = vld [vmem:[#allocation28_spill] sm:$0xff]  ;;  %v2624_v37 = vld [vmem:[#allocation29_spill] sm:$0xff] }
 0x175   : > { %1115 = vmatpush1.msra.mxu0 %v2127_v38  ;;  %1186 = vmatpush1.msra.mxu1 %v2129_v39  ;;  %v2625_v38 = vld [vmem:[#allocation30_spill] sm:$0xff]  ;;  %v2626_v39 = vld [vmem:[#allocation31_spill] sm:$0xff] }
 0x176   : > { %1116 = vmatprep.subr.mxu0 %v2133_v40  ;;  %1187 = vmatprep.subr.mxu1 %v2135_v41  ;;  %v2627_v40 = vld [vmem:[#allocation32_spill] sm:$0xff]  ;;  %v2628_v41 = vld [vmem:[#allocation33_spill] sm:$0xff] }
 0x177   : > { %1117 = vmatpush1.msra.mxu0 %v2139_v42  ;;  %1188 = vmatpush1.msra.mxu1 %v2141_v43  ;;  %v2629_v42 = vld [vmem:[#allocation34_spill] sm:$0xff]  ;;  %v2630_v43 = vld [vmem:[#allocation35_spill] sm:$0xff] }
 0x178   : > { %1118 = vmatprep.subr.mxu0 %v2145_v44  ;;  %1189 = vmatprep.subr.mxu1 %v2147_v45  ;;  %v2631_v44 = vld [vmem:[#allocation36_spill] sm:$0xff]  ;;  %v2632_v45 = vmov 0.0  }
 0x179   : > { %1119 = vmatpush1.msra.mxu0 %v2151_v46  ;;  %1190 = vmatpush1.msra.mxu1 %v2153_v47  ;;  %v2633_v46 = vld [vmem:[#allocation37_spill] sm:$0xff] }
 0x17a   : > { %1120 = vmatprep.subr.mxu0 %v2157_v48  ;;  %1191 = vmatprep.subr.mxu1 %v2159_v49  ;;  %v2634_v48 = vld [vmem:[#allocation38_spill] sm:$0xff] }
 0x17b   : > { %1121 = vmatpush1.msra.mxu0 %v2163_v50  ;;  %1192 = vmatpush1.msra.mxu1 %v2165_v51 }
 0x17c   : > { %1122 = vmatprep.subr.mxu0 %v2169_v52  ;;  %1193 = vmatprep.subr.mxu1 %v2171_v53  ;;  %v2635_v52 = vld [vmem:[#allocation39_spill] sm:$0xff] }
 0x17d   : > { %1123 = vmatpush1.msra.mxu0 %v2175_v54  ;;  %1194 = vmatpush1.msra.mxu1 %v2179_v55 }
 0x17e   : > { %1124 = vmatprep.subr.mxu0 %v2184_v57  ;;  %1195 = vmatprep.subr.mxu1 %v2186_v58  ;;  %v2636_v58 = vld [vmem:[#allocation42_spill] sm:$0xff] }
 0x17f   : > { %1125 = vmatpush1.msra.mxu0 %v2190_v59  ;;  %1196 = vmatpush1.msra.mxu1 %v2194_v60  ;;  %v2637_v60 = vld [vmem:[#allocation40_spill] sm:$0xff] }
 0x180   : > { %1126 = vmatprep.subr.mxu0 %v2609_v22  ;;  %1197 = vmatprep.subr.mxu1 %v2610_v23  ;;  %v1344_v22 = vld [vmem:[#allocation8 + $0x1b8] sm:$0xff]  ;;  %v1341_v23 = vld [vmem:[#allocation8 + $0x1a0] sm:$0xff] }
 0x181   : > { %1127 = vmatpush1.msra.mxu0 %v2611_v24  ;;  %1198 = vmatpush1.msra.mxu1 %v2612_v25  ;;  %v1343_v24 = vld [vmem:[#allocation8 + $0x1b0] sm:$0xff]  ;;  %v1338_v25 = vld [vmem:[#allocation8 + $0x188] sm:$0xff] }
 0x182   : > { %1128 = vmatprep.subr.mxu0 %v2613_v26  ;;  %1199 = vmatprep.subr.mxu1 %v2614_v27  ;;  %v1340_v26 = vld [vmem:[#allocation8 + $0x198] sm:$0xff]  ;;  %v1337_v27 = vld [vmem:[#allocation8 + $0x180] sm:$0xff] }
 0x183   : > { %1129 = vmatpush1.msra.mxu0 %v2615_v28  ;;  %1200 = vmatpush1.msra.mxu1 %v2616_v29  ;;  %v1339_v28 = vld [vmem:[#allocation8 + $0x190] sm:$0xff]  ;;  %v1334_v29 = vld [vmem:[#allocation8 + $0x168] sm:$0xff] }
 0x184   : > { %1130 = vmatprep.subr.mxu0 %v2617_v30  ;;  %1201 = vmatprep.subr.mxu1 %v2618_v31  ;;  %v1336_v30 = vld [vmem:[#allocation8 + $0x178] sm:$0xff]  ;;  %v1333_v31 = vld [vmem:[#allocation8 + $0x160] sm:$0xff] }
 0x185   : > { %1131 = vmatpush1.msra.mxu0 %v2619_v32  ;;  %1202 = vmatpush1.msra.mxu1 %v2620_v33  ;;  %v1335_v32 = vld [vmem:[#allocation8 + $0x170] sm:$0xff]  ;;  %v1330_v33 = vld [vmem:[#allocation8 + $0x148] sm:$0xff] }
 0x186   : > { %1132 = vmatprep.subr.mxu0 %v2621_v34  ;;  %1203 = vmatprep.subr.mxu1 %v2622_v35  ;;  %v1332_v34 = vld [vmem:[#allocation8 + $0x158] sm:$0xff]  ;;  %v1329_v35 = vld [vmem:[#allocation8 + $0x140] sm:$0xff] }
 0x187   : > { %1133 = vmatpush1.msra.mxu0 %v2623_v36  ;;  %1204 = vmatpush1.msra.mxu1 %v2624_v37  ;;  %v1331_v36 = vld [vmem:[#allocation8 + $0x150] sm:$0xff]  ;;  %v1326_v37 = vld [vmem:[#allocation8 + $0x128] sm:$0xff] }
 0x188   : > { %1134 = vmatprep.subr.mxu0 %v2625_v38  ;;  %1205 = vmatprep.subr.mxu1 %v2626_v39  ;;  %v1328_v38 = vld [vmem:[#allocation8 + $0x138] sm:$0xff]  ;;  %v1325_v39 = vld [vmem:[#allocation8 + $0x120] sm:$0xff] }
 0x189   : > { %1135 = vmatpush1.msra.mxu0 %v2627_v40  ;;  %1206 = vmatpush1.msra.mxu1 %v2628_v41  ;;  %v1327_v40 = vld [vmem:[#allocation8 + $0x130] sm:$0xff]  ;;  %v1322_v41 = vld [vmem:[#allocation8 + $0x108] sm:$0xff] }
 0x18a   : > { %1136 = vmatprep.subr.mxu0 %v2629_v42  ;;  %1207 = vmatprep.subr.mxu1 %v2630_v43  ;;  %v1324_v42 = vld [vmem:[#allocation8 + $0x118] sm:$0xff]  ;;  %v1321_v43 = vld [vmem:[#allocation8 + $0x100] sm:$0xff] }
 0x18b   : > { %1137 = vmatpush1.msra.mxu0 %v2631_v44  ;;  %1170 = vmatprep.mubr.f32.mxu0 %v2632_v45  ;;  %v1323_v44 = vld [vmem:[#allocation8 + $0x110] sm:$0xff] }
 0x18c   : > { %1208 = vmatpush1.msra.mxu1 %v2633_v46  ;;  %1241 = vmatprep.mubr.f32.mxu1 %v2632_v45  ;;  %v1320_v46 = vld [vmem:[#allocation8 + $0xf8] sm:$0xff] }
 0x18d   : > { %1353 = vmatprep.subr.mxu0 %v1350_v9  ;;  %1424 = vmatprep.subr.mxu1 %v1352_v14  ;;  %v1291_v9 = vld [vmem:[#allocation8 + $0x10] sm:$0xff] }
 0x22c   : > { %v925_v47 = vpop.f32.mrf.mxu0  ;;  %v996_v54 = vpop.f32.mrf.mxu1 }
 0x22d   : > { %v1001_v49 = vadd.f32 %v925_v47, %v2634_v48  ;;  %v1003_v61 = vadd.f32 %v996_v54, %v2637_v60  ;;  %v1317_v47 = vld [vmem:[#allocation8 + $0xe0] sm:$0xff]  ;;  %v1319_v48 = vld [vmem:[#allocation8 + $0xf0] sm:$0xff]  ;;  %v1312_v54 = vld [vmem:[#allocation8 + $0xb8] sm:$0xff] }
 0x22e   : > { %v927_v50 = vpop.f32.mrf.mxu0  ;;  %v998_v57 = vpop.f32.mrf.mxu1  ;;  %v1305_v60 = vld [vmem:[#allocation8 + $0x80] sm:$0xff] }
 0x22f   : > { %v1651_v51 = vmul.f32 -1.442695, %v1001_v49  ;;  %v1002_v53 = vadd.f32 %v927_v50, %v2635_v52  ;;  %v1004_v59 = vadd.f32 %v998_v57, %v2636_v58  ;;  %v1314_v49 = vld [vmem:[#allocation8 + $0xc8] sm:$0xff]  ;;  %v1316_v50 = vld [vmem:[#allocation8 + $0xd8] sm:$0xff]  ;;  %v1315_v52 = vld [vmem:[#allocation8 + $0xd0] sm:$0xff] }
 0x230   : > { %v1311_v57 = vld [vmem:[#allocation8 + $0xb0] sm:$0xff]  ;;  %v1306_v58 = vld [vmem:[#allocation8 + $0x88] sm:$0xff] }
 0x231   : > { %1750 = vpow2.f32 %v1651_v51  ;;  %v1652_v55 = vmul.f32 -1.442695, %v1002_v53  ;;  %v1653_v0 = vmul.f32 -1.442695, %v1004_v59  ;;  %v1313_v51 = vld [vmem:[#allocation8 + $0xc0] sm:$0xff]  ;;  %v1310_v53 = vld [vmem:[#allocation8 + $0xa8] sm:$0xff] }
 0x232   : > { %v1308_v59 = vld [vmem:[#allocation8 + $0x98] sm:$0xff] }
 0x233   : > { %1752 = vpow2.f32 %v1652_v55  ;;  %v1309_v55 = vld [vmem:[#allocation8 + $0xa0] sm:$0xff] }
 0x234   : > { %1754 = vtanh.f32 %v1003_v61  ;;  %v1307_v61 = vld [vmem:[#allocation8 + $0x90] sm:$0xff] }
 0x235   : > { %1756 = vpow2.f32 %v1653_v0  ;;  %v1302_v0 = vld [vmem:[#allocation8 + $0x68] sm:$0xff] }
 0x23e   : > { %v1751_v12 = vpop.eup %1750 }
 0x23f   : > { %v1008_v21 = vadd.f32 1.0, %v1751_v12  ;;  %v1304_v12 = vld [vmem:[#allocation8 + $0x78] sm:$0xff] }
 0x240   : > { %v1753_v1 = vpop.eup %1752 }
 0x241   : > { %1758 = vrcp.f32 %v1008_v21  ;;  %v1014_v4 = vadd.f32 1.0, %v1753_v1  ;;  %v1755_v63 = vpop.eup %1754  ;;  %v1301_v21 = vld [vmem:[#allocation8 + $0x60] sm:$0xff]  ;;  %v1303_v1 = vld [vmem:[#allocation8 + $0x70] sm:$0xff] }
 0x242   : > { %v1757_v20 = vpop.eup %1756 }
 0x243   : > { %1760 = vrcp.f32 %v1014_v4  ;;  %v1021_v19 = vadd.f32 1.0, %v1757_v20  ;;  %v1298_v4 = vld [vmem:[#allocation8 + $0x48] sm:$0xff]  ;;  %v1297_v20 = vld [vmem:[#allocation8 + $0x40] sm:$0xff] }
 0x245   : > { %1762 = vrcp.f32 %v1021_v19  ;;  %v1293_v19 = vld [vmem:[#allocation8 + $0x20] sm:$0xff] }
 0x24e   : > { %v1759_v17 = vpop.eup %1758 }
 0x24f   : > { %v1025_v10 = vmul.f32 %v1759_v17, %v1755_v63  ;;  %v1300_v63 = vld [vmem:[#allocation8 + $0x58] sm:$0xff]  ;;  %v1299_v17 = vld [vmem:[#allocation8 + $0x50] sm:$0xff] }
 0x250   : > { %v1761_v7 = vpop.eup %1760 }
 0x251   : > { %v1024_v2 = vmul.f32 %v1761_v7, %v2381_v8  ;;  %v1348_v8 = vld [vmem:[#allocation8 + $0x1d8] sm:$0xff] }
 0x252   : > { %v1763_v62 = vpop.eup %1762  ;;  %v1296_v7 = vld [vmem:[#allocation8 + $0x38] sm:$0xff] }
 0x253   : > { %v2454_v3 = vadd.f32 %v1025_v10, %v1024_v2  ;;  %v1294_v10 = vld [vmem:[#allocation8 + $0x28] sm:$0xff]  ;;  %v1295_v2 = vld [vmem:[#allocation8 + $0x30] sm:$0xff] }
 0x255   : > { %1764 = vtanh.f32 %v2454_v3 }
 0x262   : > { %v1765_v5 = vpop.eup %1764 }
 0x263   : > { %v1028_v13 = vmul.f32 %v1765_v5, %v1763_v62  ;;  %v1290_v62 = vld [vmem:[#allocation8 + $0x8] sm:$0xff]  ;;  %v1292_v5 = vld [vmem:[#allocation8 + $0x18] sm:$0xff] }
 0x265   : > { %1654 = vst [vmem:[%s2062_s15 + $0x8] sm:$0xff] %v1028_v13  ;;  %1171 = vmatmul.mubr.f32.vlgmr.msra.gmra.mxu0 %v1028_v13  ;;  %1242 = vmatmul.mubr.f32.vlgmr.msra.gmra.mxu1 %v1028_v13  ;;  %v1289_v13 = vld [vmem:[#allocation8] sm:$0xff] }
 0x266   : > { %1417 = vmatprep.mubr.f32.mxu0 %v2632_v45  ;;  %1488 = vmatprep.mubr.f32.mxu1 %v2632_v45  ;;  %v1318_v45 = vld [vmem:[#allocation8 + $0xe8] sm:$0xff] }
 0x267   : > { %1354 = vmatpush1.msra.mxu0 %v1349_v15  ;;  %1425 = vmatpush1.msra.mxu1 %v1351_v6  ;;  %v2638_v15 = vld [vmem:[#allocation41_spill] sm:$0xff] }
 0x268   : > { %1355 = vmatprep.subr.mxu0 %v1346_v11  ;;  %1426 = vmatprep.subr.mxu1 %v1348_v8 }
 0x269   : > { %1356 = vmatpush1.msra.mxu0 %v1345_v56  ;;  %1427 = vmatpush1.msra.mxu1 %v1347_v16  ;;  %v2639_v56 = vld [vmem:[#allocation43_spill] sm:$0xff] }
 0x26a   : > { %1357 = vmatprep.subr.mxu0 %v1342_v18  ;;  %1428 = vmatprep.subr.mxu1 %v1344_v22 }
 0x26b   : > { %1358 = vmatpush1.msra.mxu0 %v1341_v23  ;;  %1429 = vmatpush1.msra.mxu1 %v1343_v24  ;;  %v2640_v24 = vld [vmem:[#allocation46_spill] sm:$0xff] }
 0x26c   : > { %1359 = vmatprep.subr.mxu0 %v1338_v25  ;;  %1430 = vmatprep.subr.mxu1 %v1340_v26  ;;  %v2641_v26 = vld [vmem:[#allocation44_spill] sm:$0xff] }
 0x26d   : > { %1360 = vmatpush1.msra.mxu0 %v1337_v27  ;;  %1431 = vmatpush1.msra.mxu1 %v1339_v28 }
 0x26e   : > { %1361 = vmatprep.subr.mxu0 %v1334_v29  ;;  %1432 = vmatprep.subr.mxu1 %v1336_v30 }
 0x26f   : > { %1362 = vmatpush1.msra.mxu0 %v1333_v31  ;;  %1433 = vmatpush1.msra.mxu1 %v1335_v32 }
 0x270   : > { %1363 = vmatprep.subr.mxu0 %v1330_v33  ;;  %1434 = vmatprep.subr.mxu1 %v1332_v34 }
 0x271   : > { %1364 = vmatpush1.msra.mxu0 %v1329_v35  ;;  %1435 = vmatpush1.msra.mxu1 %v1331_v36 }
 0x272   : > { %1365 = vmatprep.subr.mxu0 %v1326_v37  ;;  %1436 = vmatprep.subr.mxu1 %v1328_v38 }
 0x273   : > { %1366 = vmatpush1.msra.mxu0 %v1325_v39  ;;  %1437 = vmatpush1.msra.mxu1 %v1327_v40 }
 0x274   : > { %1367 = vmatprep.subr.mxu0 %v1322_v41  ;;  %1438 = vmatprep.subr.mxu1 %v1324_v42 }
 0x275   : > { %1368 = vmatpush1.msra.mxu0 %v1321_v43  ;;  %1439 = vmatpush1.msra.mxu1 %v1323_v44 }
 0x276   : > { %1369 = vmatprep.subr.mxu0 %v1318_v45  ;;  %1440 = vmatprep.subr.mxu1 %v1320_v46  ;;  %v2642_v45 = vld [vmem:[#allocation45_spill] sm:$0xff] }
 0x277   : > { %1370 = vmatpush1.msra.mxu0 %v1317_v47  ;;  %1441 = vmatpush1.msra.mxu1 %v1319_v48 }
 0x278   : > { %1371 = vmatprep.subr.mxu0 %v1314_v49  ;;  %1442 = vmatprep.subr.mxu1 %v1316_v50  ;;  %v2643_v49 = vld [vmem:[#allocation47_spill] sm:$0xff] }
 0x279   : > { %1372 = vmatpush1.msra.mxu0 %v1313_v51  ;;  %1443 = vmatpush1.msra.mxu1 %v1315_v52 }
 0x27a   : > { %1373 = vmatprep.subr.mxu0 %v1310_v53  ;;  %1444 = vmatprep.subr.mxu1 %v1312_v54  ;;  %v2644_v53 = vld [vmem:[#allocation49_spill] sm:$0xff] }
 0x27b   : > { %1374 = vmatpush1.msra.mxu0 %v1309_v55  ;;  %1445 = vmatpush1.msra.mxu1 %v1311_v57  ;;  %v2645_v55 = vld [vmem:[#allocation48_spill] sm:$0xff] }
 0x27c   : > { %1375 = vmatprep.subr.mxu0 %v1306_v58  ;;  %1446 = vmatprep.subr.mxu1 %v1308_v59 }
 0x27d   : > { %1376 = vmatpush1.msra.mxu0 %v1305_v60  ;;  %1447 = vmatpush1.msra.mxu1 %v1307_v61 }
 0x27e   : > { %1377 = vmatprep.subr.mxu0 %v1302_v0  ;;  %1448 = vmatprep.subr.mxu1 %v1304_v12 }
 0x27f   : > { %1378 = vmatpush1.msra.mxu0 %v1301_v21  ;;  %1449 = vmatpush1.msra.mxu1 %v1303_v1 }
 0x280   : > { %1379 = vmatprep.subr.mxu0 %v1298_v4  ;;  %1450 = vmatprep.subr.mxu1 %v1300_v63 }
 0x281   : > { %1380 = vmatpush1.msra.mxu0 %v1297_v20  ;;  %1451 = vmatpush1.msra.mxu1 %v1299_v17 }
 0x282   : > { %1381 = vmatprep.subr.mxu0 %v1294_v10  ;;  %1452 = vmatprep.subr.mxu1 %v1296_v7 }
 0x283   : > { %1382 = vmatpush1.msra.mxu0 %v1293_v19  ;;  %1453 = vmatpush1.msra.mxu1 %v1295_v2 }
 0x284   : > { %1383 = vmatprep.subr.mxu0 %v1290_v62  ;;  %1454 = vmatprep.subr.mxu1 %v1292_v5 }
 0x285   : > { %1384 = vmatpush1.msra.mxu0 %v1289_v13  ;;  %1455 = vmatpush1.msra.mxu1 %v1291_v9 }
 0x325   : > { %v1172_v14 = vpop.f32.mrf.mxu0  ;;  %v1243_v18 = vpop.f32.mrf.mxu1 }
 0x326   : > { %v1248_v6 = vadd.f32 %v1172_v14, %v2638_v15  ;;  %v1250_v27 = vadd.f32 %v1243_v18, %v2641_v26 }
 0x327   : > { %v1174_v11 = vpop.f32.mrf.mxu0  ;;  %v1245_v23 = vpop.f32.mrf.mxu1 }
 0x328   : > { %v1655_v8 = vmul.f32 -1.442695, %v1248_v6  ;;  %v1249_v16 = vadd.f32 %v1174_v11, %v2639_v56  ;;  %v1251_v25 = vadd.f32 %v1245_v23, %v2640_v24 }
 0x32a   : > { %1766 = vpow2.f32 %v1655_v8  ;;  %v1656_v22 = vmul.f32 -1.442695, %v1249_v16  ;;  %v1657_v28 = vmul.f32 -1.442695, %v1251_v25 }
 0x32c   : > { %1768 = vpow2.f32 %v1656_v22 }
 0x32d   : > { %1770 = vtanh.f32 %v1250_v27 }
 0x32e   : > { %1772 = vpow2.f32 %v1657_v28 }
 0x337   : > { %v1767_v29 = vpop.eup %1766 }
 0x338   : > { %v1255_v30 = vadd.f32 1.0, %v1767_v29 }
 0x339   : > { %v1769_v31 = vpop.eup %1768 }
 0x33a   : > { %1774 = vrcp.f32 %v1255_v30  ;;  %v1261_v32 = vadd.f32 1.0, %v1769_v31  ;;  %v1771_v33 = vpop.eup %1770 }
 0x33b   : > { %v1773_v34 = vpop.eup %1772 }
 0x33c   : > { %1776 = vrcp.f32 %v1261_v32  ;;  %v1268_v38 = vadd.f32 1.0, %v1773_v34 }
 0x33e   : > { %1778 = vrcp.f32 %v1268_v38 }
 0x347   : > { %v1775_v35 = vpop.eup %1774 }
 0x348   : > { %v1272_v36 = vmul.f32 %v1775_v35, %v1771_v33 }
 0x349   : > { %v1777_v37 = vpop.eup %1776 }
 0x34a   : > { %v1271_v39 = vmul.f32 %v1777_v37, %v2454_v3 }
 0x34b   : > { %v1779_v41 = vpop.eup %1778 }
 0x34c   : > { %v1273_v40 = vadd.f32 %v1272_v36, %v1271_v39 }
 0x34e   : > { %1780 = vtanh.f32 %v1273_v40 }
 0x35b   : > { %v1781_v42 = vpop.eup %1780 }
 0x35c   : > { %v1275_v43 = vmul.f32 %v1781_v42, %v1779_v41 }
 0x35e   : > { %1658 = vst [vmem:[%s2062_s15 + $0x10] sm:$0xff] %v1275_v43  ;;  %1418 = vmatmul.mubr.f32.vlgmr.msra.gmra.mxu0 %v1275_v43  ;;  %1489 = vmatmul.mubr.f32.vlgmr.msra.gmra.mxu1 %v1275_v43 }
 0x41e   : > { %v1419_v44 = vpop.f32.mrf.mxu0  ;;  %v1490_v51 = vpop.f32.mrf.mxu1 }
 0x41f   : > { %v1495_v46 = vadd.f32 %v1419_v44, %v2642_v45  ;;  %v1497_v57 = vadd.f32 %v1490_v51, %v2645_v55 }
 0x420   : > { %v1421_v47 = vpop.f32.mrf.mxu0  ;;  %v1492_v3 = vpop.f32.mrf.mxu1 }
 0x421   : > { %v1659_v48 = vmul.f32 -1.442695, %v1495_v46  ;;  %v1496_v50 = vadd.f32 %v1421_v47, %v2643_v49  ;;  %v1498_v54 = vadd.f32 %v1492_v3, %v2644_v53 }
 0x423   : > { %1782 = vpow2.f32 %v1659_v48  ;;  %v1660_v52 = vmul.f32 -1.442695, %v1496_v50  ;;  %v1661_v58 = vmul.f32 -1.442695, %v1498_v54 }
 0x425   : > { %1784 = vpow2.f32 %v1660_v52 }
 0x426   : > { %1786 = vtanh.f32 %v1497_v57 }
 0x427   : > { %1788 = vpow2.f32 %v1661_v58 }
 0x430   : > { %v1783_v59 = vpop.eup %1782 }
 0x431   : > { %v1502_v60 = vadd.f32 1.0, %v1783_v59 }
 0x432   : > { %v1785_v61 = vpop.eup %1784 }
 0x433   : > { %1790 = vrcp.f32 %v1502_v60  ;;  %v1508_v0 = vadd.f32 1.0, %v1785_v61  ;;  %v1787_v12 = vpop.eup %1786 }
 0x434   : > { %v1789_v21 = vpop.eup %1788 }
 0x435   : > { %1792 = vrcp.f32 %v1508_v0  ;;  %v1515_v20 = vadd.f32 1.0, %v1789_v21 }
 0x437   : > { %1794 = vrcp.f32 %v1515_v20 }
 0x440   : > { %v1791_v1 = vpop.eup %1790 }
 0x441   : > { %v1519_v4 = vmul.f32 %v1791_v1, %v1787_v12 }
 0x442   : > { %v1793_v63 = vpop.eup %1792 }
 0x443   : > { %v1518_v17 = vmul.f32 %v1793_v63, %v1273_v40 }
 0x444   : > { %v1795_v7 = vpop.eup %1794 }
 0x445   : > { %v1520_v10 = vadd.f32 %v1519_v4, %v1518_v17 }
 0x447   : > { %1796 = vtanh.f32 %v1520_v10  ;;  %1523 = vst [vmem:[#allocation3] sm:$0xff] %v1520_v10 }
 0x454   : > { %v1797_v19 = vpop.eup %1796 }
 0x455   : > { %v1522_v2 = vmul.f32 %v1797_v19, %v1795_v7 }
 0x457   : > { %1524 = vst [vmem:[#allocation2] sm:$0xff] %v1522_v2  ;;  %1662 = vst [vmem:[%s2062_s15 + $0x18] sm:$0xff] %v1522_v2 }
 0x458   : > { %1863 = shalt.err (!%p1860_p3)
}
 0x459   : > { %s1864_s29 = scalar_lea.hbm %s2475_s12, 512  ;;  %s1868_s19 = scalar_lea.hbm %s2528_s6, 1024 }
 0x45a   : > { %p1865_p7 = scmp.ne.s32.totalorder %s2475_s12, %s1864_s29  ;;  %p1869_p6 = scmp.lt.s32.totalorder %s2475_s12, %s2528_s6 }
 0x45b   : > { %p1870_p10 = scmp.lt.s32.totalorder %s1868_s19, %s1864_s29 }
 0x45c   : > { %p1866_p9 = pnand %p1865_p7, %p2001_p5 }
 0x45d   : > { %p1871_p11 = por %p1870_p10, %p1869_p6 }
 0x45e   : > { %p1867_p0 = pneg %p1866_p9 }
 0x460   : > { %p1872_p13 = pnand %p1871_p11, %p1867_p0 }
 0x462   : > { %1875 = shalt.err (!%p1872_p13)
}
 0x463   : > { %s1926_s28 = smov 128   ;;  %s1927_s9 = smov 8  }
 0x464   : > { %1677 = dma.vmem_to_hbm [thread:$0]  (%p2001_p5), %s2477_s10, 512, %s2475_s12, %s2482_s13, %s1926_s28, %s1926_s28, %s1927_s9  }
 0x465 PF: > { %p1694_p8 = scmp.ge.s32.totalorder %s1918_s24, 2  ;;  %s1556_s11 = sand.u32 1, %s1906_s21  }
 0x466   : > { %p2646_p12 = scmp.ne.s32.totalorder %s2561_s8, 0  ;;  %s1557_s25 = scalar_lea.sflag [#allocation7], %s1556_s11 }
 0x468   : > { %p1687_p1 = pnand %p1694_p8, %p2646_p12 }
 0x46a   : > { %p1688_p2 = pneg %p1687_p1 }
 0x46c   : > { %1901 = dma.done.wait (%p1688_p2), %s1557_s25, 512  }
 0x46d   : > { %1903 = vsyncadd (%p1688_p2), %s1557_s25, 4294966784  ;;  %p18_p4 = scmp.ge.s32.totalorder %s1988_s27, 4   ;;  %s2647_s21 = smov %s1910_s22 }
 0x46e   : > { %s2648_s22 = smov %s1914_s23  ;;  %s2649_s23 = smov %s1999_s30 }
 0x46f   : > { %s2650_s24 = smov %s1988_s27  ;;  %20 = sbr.rel (!%p18_p4) target bundleno = 5 (0x5), region = 99 }
 0x474   :  { %1562 = vsyncpa [#allocation6], 1 }
 0x475   :  { %1564 = vsyncpa [#allocation6 + $0x1], 1 }
 0x476   :  { %1565 = vsyncpa [#allocation9], 1 }
 0x477   :  { %1566 = vsyncpa [#allocation7], 1 }
 0x478   :  { %1568 = vsyncpa [#allocation7 + $0x1], 1 }

</bundles_post_ra>
